<compile_context>
chip_gen: v7x
topology: tpu7x:2x2x1
jax: 0.10.0
libtpu: 0.0.40
codegen_flags: <defaults>
</compile_context>

<pallas_src>
import math

import jax
import jax.numpy as jnp
from jax.experimental import pallas as pl
from jax.experimental.pallas import tpu as pltpu

_INV_SQRT2 = 0.7071067811865476
_LPAD = 8   # interior of the column-padded scratch starts at sublane offset 8 (aligned stores)


def _gelu_exact(v):
    # PyTorch nn.GELU default = exact erf formulation.
    return 0.5 * v * (1.0 + jax.lax.erf(v * _INV_SQRT2))


def cross_act_glu_kernel(
    x_ref, y_ref,
    wfx_ref, wfy_ref, bf_ref,
    w1y_ref, b1y_ref,
    wdwg_ref, bdwg_ref,
    wdwy_ref, bdwy_ref,
    w2_ref, b2_ref,
    o_ref,
    gpad_ref, ypad_ref,
):
    # Blocks: x/y -> (1, H+2, W, C) (full zero-row-padded image, resident across row tiles);
    #         o   -> (1, TH, W, Out) row tile; scratch -> (TH+2, W+_LPAD+1, Hid) f32.
    _, TH, W, Out = o_ref.shape
    Hid = gpad_ref.shape[-1]
    WIN = TH + 2

    i = pl.program_id(1)
    nt = pl.num_programs(1)

    row0 = i * TH
    if TH % 8 == 0:
        row0 = pl.multiple_of(row0, 8)

    # (TH+2)-row window (1-row halo each side) of the padded inputs; halo rows are recomputed.
    xw = x_ref[0, pl.ds(row0, WIN), :, :]          # (WIN, W, C)
    yw = y_ref[0, pl.ds(row0, WIN), :, :]
    C = xw.shape[-1]
    x2 = xw.reshape(WIN * W, C)
    y2 = yw.reshape(WIN * W, C)

    # fc1_g(merge_fc_g([x, y])) fused into one 1x1 conv:  g = x @ Wfx + y @ Wfy + bf
    g = (jnp.dot(x2, wfx_ref[...], preferred_element_type=jnp.float32)
         + jnp.dot(y2, wfy_ref[...], preferred_element_type=jnp.float32)
         + bf_ref[...])                            # (WIN*W, Hid) f32
    yh = (jnp.dot(y2, w1y_ref[...], preferred_element_type=jnp.float32)
          + b1y_ref[...])                          # (WIN*W, Hid) f32

    # Store window into column-padded scratch (interior at aligned sublane offset _LPAD).
    gpad_ref[:, _LPAD:_LPAD + W, :] = g.reshape(WIN, W, Hid)
    ypad_ref[:, _LPAD:_LPAD + W, :] = yh.reshape(WIN, W, Hid)

    # Zero only the halo: the two guard columns every step, the guard row only on boundary tiles.
    zero_col = jnp.zeros((WIN, 1, Hid), jnp.float32)
    gpad_ref[:, _LPAD - 1:_LPAD, :] = zero_col
    ypad_ref[:, _LPAD - 1:_LPAD, :] = zero_col
    gpad_ref[:, _LPAD + W:_LPAD + W + 1, :] = zero_col
    ypad_ref[:, _LPAD + W:_LPAD + W + 1, :] = zero_col

    zero_row = jnp.zeros((1, W, Hid), jnp.float32)

    @pl.when(i == 0)
    def _():  # top of the image: halo row is conv zero-padding, not fc(0)=bias
        gpad_ref[0:1, _LPAD:_LPAD + W, :] = zero_row
        ypad_ref[0:1, _LPAD:_LPAD + W, :] = zero_row

    @pl.when(i == nt - 1)
    def _():  # bottom of the image
        gpad_ref[WIN - 1:WIN, _LPAD:_LPAD + W, :] = zero_row
        ypad_ref[WIN - 1:WIN, _LPAD:_LPAD + W, :] = zero_row

    # Depthwise 3x3, pad=1: extract each dx-shifted column plane once and reuse it for
    # all three dy taps (outer-dim slices, cheap) and both branches.
    wdwg = wdwg_ref[...]                           # (9, 1, Hid)
    wdwy = wdwy_ref[...]
    g_dw = jnp.broadcast_to(bdwg_ref[...], (TH, W, Hid))
    y_dw = jnp.broadcast_to(bdwy_ref[...], (TH, W, Hid))
    for dx in range(3):
        c0 = _LPAD - 1 + dx
        gplane = gpad_ref[:, c0:c0 + W, :]         # (WIN, W, Hid)
        yplane = ypad_ref[:, c0:c0 + W, :]
        for dy in range(3):
            k = dy * 3 + dx
            g_dw = g_dw + gplane[dy:dy + TH] * wdwg[k]
            y_dw = y_dw + yplane[dy:dy + TH] * wdwy[k]

    # Gated activation (exact erf GELU) then fc2 (1x1 conv as matmul). Dropout p=0 -> identity.
    h = (_gelu_exact(g_dw) * y_dw).reshape(TH * W, Hid)
    out = (jnp.dot(h.astype(w2_ref.dtype), w2_ref[...],
                   preferred_element_type=jnp.float32)
           + b2_ref[...])                          # (TH*W, Out) f32
    o_ref[0] = out.reshape(TH, W, Out).astype(o_ref.dtype)


def cross_act_glu(x_nchw, y_nchw, params, *, row_block=8, matmul_dtype=jnp.bfloat16):
    """x, y: NCHW float32. Returns NCHW float32.

    matmul_dtype: dtype of the 1x1-conv matmul operands (accumulation is always f32).
    """
    x = jnp.transpose(x_nchw, (0, 2, 3, 1)).astype(jnp.float32)   # NHWC
    y = jnp.transpose(y_nchw, (0, 2, 3, 1)).astype(jnp.float32)
    B, H, W, C = x.shape
    Hid = params["w1g"].shape[1]
    Out = params["w2"].shape[1]
    assert W % 8 == 0, "W must be a multiple of 8 so in-kernel reshapes stay layout-preserving"

    # Row tile size: largest value <= row_block that divides H.
    th = max(1, min(row_block, H))
    while H % th:
        th -= 1
    nt = H // th

    # Fuse merge_fc_g with fc1_g (exact up to f32 reassociation); pre-split so the kernel
    # never slices the weight at a non-tile-aligned row offset.
    wm, w1g = params["wm"], params["w1g"]
    wfx = wm[:C] @ w1g                       # (C, Hid)
    wfy = wm[C:] @ w1g                       # (C, Hid)
    bf = params["bm"] @ w1g + params["b1g"]  # (1, Hid)

    mmd = matmul_dtype
    # Zero-pad one row top/bottom so every row tile reads a uniform (TH+2)-row window.
    x_pad = jnp.pad(x, ((0, 0), (1, 1), (0, 0), (0, 0))).astype(mmd)
    y_pad = jnp.pad(y, ((0, 0), (1, 1), (0, 0), (0, 0))).astype(mmd)

    weights = [
        wfx.astype(mmd), wfy.astype(mmd), bf.astype(jnp.float32),
        params["w1y"].astype(mmd), params["b1y"].astype(jnp.float32),
        params["wdwg"].astype(jnp.float32), params["bdwg"].astype(jnp.float32),
        params["wdwy"].astype(jnp.float32), params["bdwy"].astype(jnp.float32),
        params["w2"].astype(mmd), params["b2"].astype(jnp.float32),
    ]

    img_spec = pl.BlockSpec((1, H + 2, W, C), lambda b, i: (b, 0, 0, 0))

    def full_spec(shape):
        nd = len(shape)
        return pl.BlockSpec(shape, lambda b, i, nd=nd: (0,) * nd)

    in_specs = [img_spec, img_spec] + [full_spec(w.shape) for w in weights]

    out = pl.pallas_call(
        cross_act_glu_kernel,
        out_shape=jax.ShapeDtypeStruct((B, H, W, Out), jnp.float32),
        grid_spec=pltpu.PrefetchScalarGridSpec(
            num_scalar_prefetch=0,
            grid=(B, nt),
            in_specs=in_specs,
            out_specs=pl.BlockSpec((1, th, W, Out), lambda b, i: (b, i, 0, 0)),
            scratch_shapes=[
                pltpu.VMEM((th + 2, W + _LPAD + 1, Hid), jnp.float32),
                pltpu.VMEM((th + 2, W + _LPAD + 1, Hid), jnp.float32),
            ],
        ),
        compiler_params=pltpu.CompilerParams(
            dimension_semantics=("parallel", "parallel"),
            vmem_limit_bytes=48 * 1024 * 1024,
        ),
    )(x_pad, y_pad, *weights)

    return jnp.transpose(out, (0, 3, 1, 2))


def reference(x_nchw, y_nchw, p):
    """Pure-JAX reference using lax conv (NHWC internally), unfused weights."""
    x = jnp.transpose(x_nchw, (0, 2, 3, 1))
    y = jnp.transpose(y_nchw, (0, 2, 3, 1))

    def pw(z, w, b):  # 1x1 conv
        return jnp.einsum("bhwc,cd->bhwd", z, w) + b.reshape(1, 1, 1, -1)

    def dw(z, w3, b):  # depthwise 3x3, pad 1
        o = jax.lax.conv_general_dilated(
            z, w3[:, :, None, :], (1, 1), "SAME",
            dimension_numbers=("NHWC", "HWIO", "NHWC"),
            feature_group_count=z.shape[-1])
        return o + b.reshape(1, 1, 1, -1)

    xy = pw(jnp.concatenate([x, y], -1), p["wm"], p["bm"])
    g = dw(pw(xy, p["w1g"], p["b1g"]), p["wdw_g3"], p["bdwg"])
    yh = dw(pw(y, p["w1y"], p["b1y"]), p["wdw_y3"], p["bdwy"])
    h = jax.nn.gelu(g, approximate=False) * yh
    out = pw(h, p["w2"], p["b2"])
    return jnp.transpose(out, (0, 3, 1, 2))


def make_params(key, C, Hid, Out):
    ks = jax.random.split(key, 12)
    n = jax.random.normal
    p = {}
    # 1x1 convs stored as (Cin, Cout) matmul matrices; std matches PyTorch conv init.
    p["wm"] = n(ks[0], (2 * C, C), jnp.float32) * math.sqrt(2.0 / C)
    p["bm"] = n(ks[1], (1, C), jnp.float32) * 0.01
    p["w1g"] = n(ks[2], (C, Hid), jnp.float32) * math.sqrt(2.0 / Hid)
    p["b1g"] = n(ks[3], (1, Hid), jnp.float32) * 0.01
    p["w1y"] = n(ks[4], (C, Hid), jnp.float32) * math.sqrt(2.0 / Hid)
    p["b1y"] = n(ks[5], (1, Hid), jnp.float32) * 0.01
    # depthwise 3x3 weights, (3,3,Hid); kernel consumes them as (9,1,Hid).
    p["wdw_g3"] = n(ks[6], (3, 3, Hid), jnp.float32) * math.sqrt(2.0 / 9.0)
    p["bdwg"] = n(ks[7], (1, 1, Hid), jnp.float32) * 0.01
    p["wdw_y3"] = n(ks[8], (3, 3, Hid), jnp.float32) * math.sqrt(2.0 / 9.0)
    p["bdwy"] = n(ks[9], (1, 1, Hid), jnp.float32) * 0.01
    p["w2"] = n(ks[10], (Hid, Out), jnp.float32) * math.sqrt(2.0 / Out)
    p["b2"] = n(ks[11], (1, Out), jnp.float32) * 0.01
    p["wdwg"] = p["wdw_g3"].reshape(9, 1, Hid)
    p["wdwy"] = p["wdw_y3"].reshape(9, 1, Hid)
    return p


if __name__ == "__main__":
    B, C, H, W = 2, 4, 16, 16          # in_features = out_features = 4
    Hid = 32                            # hidden_features
    Out = C

    key = jax.random.PRNGKey(0)
    kx, ky, kp = jax.random.split(key, 3)
    x = jax.random.normal(kx, (B, C, H, W), jnp.float32)   # NCHW like PyTorch
    y = jax.random.normal(ky, (B, C, H, W), jnp.float32)
    params = make_params(kp, C, Hid, Out)

    ref = jax.block_until_ready(reference(x, y, params))

    # 1) Exact path (f32 matmul operands), multi-tile grid: validates the fused
    #    merge+fc1 weights, row tiling, halo handling, and depthwise restructure.
    out_f32 = jax.block_until_ready(
        cross_act_glu(x, y, params, row_block=8, matmul_dtype=jnp.float32))
    assert out_f32.shape == (B, Out, H, W)
    err_f32 = float(jnp.max(jnp.abs(out_f32 - ref)))
    assert jnp.allclose(out_f32, ref, rtol=1e-3, atol=1e-3), err_f32

    # 1b) Single-tile path (exercises nt == 1: both boundary-row zeroings on one tile).
    out_f32_1t = jax.block_until_ready(
        cross_act_glu(x, y, params, row_block=H, matmul_dtype=jnp.float32))
    err_1t = float(jnp.max(jnp.abs(out_f32_1t - ref)))
    assert jnp.allclose(out_f32_1t, ref, rtol=1e-3, atol=1e-3), err_1t

    # 2) bf16-operand fast path (f32 accumulation) — numerics-visible, looser tolerance.
    out_bf16 = jax.block_until_ready(
        cross_act_glu(x, y, params, row_block=8, matmul_dtype=jnp.bfloat16))
    err_bf16 = float(jnp.max(jnp.abs(out_bf16 - ref)))
    assert jnp.allclose(out_bf16, ref, rtol=1e-1, atol=1e-1), err_bf16

    print("KERNEL_OK")
</pallas_src>

<mosaic_0001>
module attributes {stable_mosaic.version = 11 : i64} {
  func.func @cross_act_glu_kernel(%arg0: i32, %arg1: i32, %arg2: memref<1x18x16x4xf32, #tpu.memory_space<vmem>>, %arg3: memref<1x18x16x4xf32, #tpu.memory_space<vmem>>, %arg4: memref<4x32xf32, #tpu.memory_space<vmem>>, %arg5: memref<4x32xf32, #tpu.memory_space<vmem>>, %arg6: memref<1x32xf32, #tpu.memory_space<vmem>>, %arg7: memref<4x32xf32, #tpu.memory_space<vmem>>, %arg8: memref<1x32xf32, #tpu.memory_space<vmem>>, %arg9: memref<9x1x32xf32, #tpu.memory_space<vmem>>, %arg10: memref<1x1x32xf32, #tpu.memory_space<vmem>>, %arg11: memref<9x1x32xf32, #tpu.memory_space<vmem>>, %arg12: memref<1x1x32xf32, #tpu.memory_space<vmem>>, %arg13: memref<32x4xf32, #tpu.memory_space<vmem>>, %arg14: memref<1x4xf32, #tpu.memory_space<vmem>>, %arg15: memref<1x8x16x4xf32, #tpu.memory_space<vmem>>, %arg16: memref<10x25x32xf32, #tpu.memory_space<vmem>>, %arg17: memref<10x25x32xf32, #tpu.memory_space<vmem>>) attributes {dimension_semantics = [#tpu.dimension_semantics<parallel>, #tpu.dimension_semantics<parallel>], iteration_bounds = array<i64: 2, 2>, scalar_prefetch = 0 : i64, scratch_operands = 2 : i64, tpu.core_type = #tpu.core_type<tc>, window_params = [{transform_indices = @transform_0, window_bounds = array<i64: 1, 18, 16, 4>}, {transform_indices = @transform_1, window_bounds = array<i64: 1, 18, 16, 4>}, {pipeline_mode = #tpu.pipeline_mode<synchronous>, transform_indices = @transform_2, window_bounds = array<i64: 4, 32>}, {pipeline_mode = #tpu.pipeline_mode<synchronous>, transform_indices = @transform_3, window_bounds = array<i64: 4, 32>}, {pipeline_mode = #tpu.pipeline_mode<synchronous>, transform_indices = @transform_4, window_bounds = array<i64: 1, 32>}, {pipeline_mode = #tpu.pipeline_mode<synchronous>, transform_indices = @transform_5, window_bounds = array<i64: 4, 32>}, {pipeline_mode = #tpu.pipeline_mode<synchronous>, transform_indices = @transform_6, window_bounds = array<i64: 1, 32>}, {pipeline_mode = #tpu.pipeline_mode<synchronous>, transform_indices = @transform_7, window_bounds = array<i64: 9, 1, 32>}, {pipeline_mode = #tpu.pipeline_mode<synchronous>, transform_indices = @transform_8, window_bounds = array<i64: 1, 1, 32>}, {pipeline_mode = #tpu.pipeline_mode<synchronous>, transform_indices = @transform_9, window_bounds = array<i64: 9, 1, 32>}, {pipeline_mode = #tpu.pipeline_mode<synchronous>, transform_indices = @transform_10, window_bounds = array<i64: 1, 1, 32>}, {pipeline_mode = #tpu.pipeline_mode<synchronous>, transform_indices = @transform_11, window_bounds = array<i64: 32, 4>}, {pipeline_mode = #tpu.pipeline_mode<synchronous>, transform_indices = @transform_12, window_bounds = array<i64: 1, 4>}, {transform_indices = @transform_13, window_bounds = array<i64: 1, 8, 16, 4>}]} {
    %c8_i32 = arith.constant 8 : i32
    %0 = arith.muli %arg1, %c8_i32 : i32
    %1 = tpu.assume_multiple %0, 8 : i32
    %c0 = arith.constant 0 : index
    %2 = arith.index_cast %1 : i32 to index
    %c0_0 = arith.constant 0 : index
    %c0_1 = arith.constant 0 : index
    %3 = vector.load %arg2[%c0, %2, %c0_0, %c0_1] : memref<1x18x16x4xf32, #tpu.memory_space<vmem>>, vector<1x10x16x4xf32>
    %4 = vector.shape_cast %3 : vector<1x10x16x4xf32> to vector<10x16x4xf32>
    %c0_2 = arith.constant 0 : index
    %5 = arith.index_cast %1 : i32 to index
    %c0_3 = arith.constant 0 : index
    %c0_4 = arith.constant 0 : index
    %6 = vector.load %arg3[%c0_2, %5, %c0_3, %c0_4] : memref<1x18x16x4xf32, #tpu.memory_space<vmem>>, vector<1x10x16x4xf32>
    %7 = vector.shape_cast %6 : vector<1x10x16x4xf32> to vector<10x16x4xf32>
    %8 = vector.shape_cast %4 : vector<10x16x4xf32> to vector<160x4xf32>
    %9 = vector.shape_cast %7 : vector<10x16x4xf32> to vector<160x4xf32>
    %c0_5 = arith.constant 0 : index
    %c0_6 = arith.constant 0 : index
    %10 = vector.load %arg4[%c0_5, %c0_6] : memref<4x32xf32, #tpu.memory_space<vmem>>, vector<4x32xf32>
    %cst = arith.constant dense<0.000000e+00> : vector<160x32xf32>
    %11 = tpu.matmul %8, %10, %cst {dimension_numbers = #tpu.dot_dimension_numbers<[1], [0], [0], [1], [0, 0, 1, 1], [], []>} : vector<160x4xf32>, vector<4x32xf32>, vector<160x32xf32> -> vector<160x32xf32>
    %c0_7 = arith.constant 0 : index
    %c0_8 = arith.constant 0 : index
    %12 = vector.load %arg5[%c0_7, %c0_8] : memref<4x32xf32, #tpu.memory_space<vmem>>, vector<4x32xf32>
    %cst_9 = arith.constant dense<0.000000e+00> : vector<160x32xf32>
    %13 = tpu.matmul %9, %12, %cst_9 {dimension_numbers = #tpu.dot_dimension_numbers<[1], [0], [0], [1], [0, 0, 1, 1], [], []>} : vector<160x4xf32>, vector<4x32xf32>, vector<160x32xf32> -> vector<160x32xf32>
    %14 = arith.addf %11, %13 : vector<160x32xf32>
    %c0_10 = arith.constant 0 : index
    %c0_11 = arith.constant 0 : index
    %15 = vector.load %arg6[%c0_10, %c0_11] : memref<1x32xf32, #tpu.memory_space<vmem>>, vector<1x32xf32>
    %16 = vector.broadcast %15 : vector<1x32xf32> to vector<160x32xf32>
    %17 = arith.addf %14, %16 : vector<160x32xf32>
    %c0_12 = arith.constant 0 : index
    %c0_13 = arith.constant 0 : index
    %18 = vector.load %arg7[%c0_12, %c0_13] : memref<4x32xf32, #tpu.memory_space<vmem>>, vector<4x32xf32>
    %cst_14 = arith.constant dense<0.000000e+00> : vector<160x32xf32>
    %19 = tpu.matmul %9, %18, %cst_14 {dimension_numbers = #tpu.dot_dimension_numbers<[1], [0], [0], [1], [0, 0, 1, 1], [], []>} : vector<160x4xf32>, vector<4x32xf32>, vector<160x32xf32> -> vector<160x32xf32>
    %c0_15 = arith.constant 0 : index
    %c0_16 = arith.constant 0 : index
    %20 = vector.load %arg8[%c0_15, %c0_16] : memref<1x32xf32, #tpu.memory_space<vmem>>, vector<1x32xf32>
    %21 = vector.broadcast %20 : vector<1x32xf32> to vector<160x32xf32>
    %22 = arith.addf %19, %21 : vector<160x32xf32>
    %23 = vector.shape_cast %17 : vector<160x32xf32> to vector<10x16x32xf32>
    %c0_17 = arith.constant 0 : index
    %c8 = arith.constant 8 : index
    %c0_18 = arith.constant 0 : index
    %24 = vector.load %arg16[%c0_17, %c8, %c0_18] : memref<10x25x32xf32, #tpu.memory_space<vmem>>, vector<10x16x32xf32>
    tpu.vector_store %arg16[%c0_17, %c8, %c0_18], %23 {strides = array<i32>} : memref<10x25x32xf32, #tpu.memory_space<vmem>>, vector<10x16x32xf32>,
    %25 = vector.shape_cast %22 : vector<160x32xf32> to vector<10x16x32xf32>
    %c0_19 = arith.constant 0 : index
    %c8_20 = arith.constant 8 : index
    %c0_21 = arith.constant 0 : index
    %26 = vector.load %arg17[%c0_19, %c8_20, %c0_21] : memref<10x25x32xf32, #tpu.memory_space<vmem>>, vector<10x16x32xf32>
    tpu.vector_store %arg17[%c0_19, %c8_20, %c0_21], %25 {strides = array<i32>} : memref<10x25x32xf32, #tpu.memory_space<vmem>>, vector<10x16x32xf32>,
    %cst_22 = arith.constant 0.000000e+00 : f32
    %27 = vector.broadcast %cst_22 : f32 to vector<10x1x32xf32>
    %c0_23 = arith.constant 0 : index
    %c7 = arith.constant 7 : index
    %c0_24 = arith.constant 0 : index
    %28 = vector.load %arg16[%c0_23, %c7, %c0_24] : memref<10x25x32xf32, #tpu.memory_space<vmem>>, vector<10x1x32xf32>
    tpu.vector_store %arg16[%c0_23, %c7, %c0_24], %27 {strides = array<i32>} : memref<10x25x32xf32, #tpu.memory_space<vmem>>, vector<10x1x32xf32>,
    %c0_25 = arith.constant 0 : index
    %c7_26 = arith.constant 7 : index
    %c0_27 = arith.constant 0 : index
    %29 = vector.load %arg17[%c0_25, %c7_26, %c0_27] : memref<10x25x32xf32, #tpu.memory_space<vmem>>, vector<10x1x32xf32>
    tpu.vector_store %arg17[%c0_25, %c7_26, %c0_27], %27 {strides = array<i32>} : memref<10x25x32xf32, #tpu.memory_space<vmem>>, vector<10x1x32xf32>,
    %c0_28 = arith.constant 0 : index
    %c24 = arith.constant 24 : index
    %c0_29 = arith.constant 0 : index
    %30 = vector.load %arg16[%c0_28, %c24, %c0_29] : memref<10x25x32xf32, #tpu.memory_space<vmem>>, vector<10x1x32xf32>
    tpu.vector_store %arg16[%c0_28, %c24, %c0_29], %27 {strides = array<i32>} : memref<10x25x32xf32, #tpu.memory_space<vmem>>, vector<10x1x32xf32>,
    %c0_30 = arith.constant 0 : index
    %c24_31 = arith.constant 24 : index
    %c0_32 = arith.constant 0 : index
    %31 = vector.load %arg17[%c0_30, %c24_31, %c0_32] : memref<10x25x32xf32, #tpu.memory_space<vmem>>, vector<10x1x32xf32>
    tpu.vector_store %arg17[%c0_30, %c24_31, %c0_32], %27 {strides = array<i32>} : memref<10x25x32xf32, #tpu.memory_space<vmem>>, vector<10x1x32xf32>,
    %cst_33 = arith.constant 0.000000e+00 : f32
    %32 = vector.broadcast %cst_33 : f32 to vector<1x16x32xf32>
    %c0_i32 = arith.constant 0 : i32
    %33 = arith.cmpi eq, %arg1, %c0_i32 : i32
    %34 = arith.extui %33 : i1 to i32
    %c0_i32_34 = arith.constant 0 : i32
    %35 = arith.cmpi ne, %34, %c0_i32_34 : i32
    scf.if %35 {
      %c0_77 = arith.constant 0 : index
      %c8_78 = arith.constant 8 : index
      %c0_79 = arith.constant 0 : index
      %198 = vector.load %arg16[%c0_77, %c8_78, %c0_79] : memref<10x25x32xf32, #tpu.memory_space<vmem>>, vector<1x16x32xf32>
      tpu.vector_store %arg16[%c0_77, %c8_78, %c0_79], %32 {strides = array<i32>} : memref<10x25x32xf32, #tpu.memory_space<vmem>>, vector<1x16x32xf32>,
      %c0_80 = arith.constant 0 : index
      %c8_81 = arith.constant 8 : index
      %c0_82 = arith.constant 0 : index
      %199 = vector.load %arg17[%c0_80, %c8_81, %c0_82] : memref<10x25x32xf32, #tpu.memory_space<vmem>>, vector<1x16x32xf32>
      tpu.vector_store %arg17[%c0_80, %c8_81, %c0_82], %32 {strides = array<i32>} : memref<10x25x32xf32, #tpu.memory_space<vmem>>, vector<1x16x32xf32>,
    } else {
    }
    %c1_i32 = arith.constant 1 : i32
    %36 = arith.cmpi eq, %arg1, %c1_i32 : i32
    %37 = arith.extui %36 : i1 to i32
    %c0_i32_35 = arith.constant 0 : i32
    %38 = arith.cmpi ne, %37, %c0_i32_35 : i32
    scf.if %38 {
      %c9_77 = arith.constant 9 : index
      %c8_78 = arith.constant 8 : index
      %c0_79 = arith.constant 0 : index
      %198 = vector.load %arg16[%c9_77, %c8_78, %c0_79] : memref<10x25x32xf32, #tpu.memory_space<vmem>>, vector<1x16x32xf32>
      tpu.vector_store %arg16[%c9_77, %c8_78, %c0_79], %32 {strides = array<i32>} : memref<10x25x32xf32, #tpu.memory_space<vmem>>, vector<1x16x32xf32>,
      %c9_80 = arith.constant 9 : index
      %c8_81 = arith.constant 8 : index
      %c0_82 = arith.constant 0 : index
      %199 = vector.load %arg17[%c9_80, %c8_81, %c0_82] : memref<10x25x32xf32, #tpu.memory_space<vmem>>, vector<1x16x32xf32>
      tpu.vector_store %arg17[%c9_80, %c8_81, %c0_82], %32 {strides = array<i32>} : memref<10x25x32xf32, #tpu.memory_space<vmem>>, vector<1x16x32xf32>,
    } else {
    }
    %c0_36 = arith.constant 0 : index
    %c0_37 = arith.constant 0 : index
    %c0_38 = arith.constant 0 : index
    %39 = vector.load %arg9[%c0_36, %c0_37, %c0_38] : memref<9x1x32xf32, #tpu.memory_space<vmem>>, vector<9x1x32xf32>
    %c0_39 = arith.constant 0 : index
    %c0_40 = arith.constant 0 : index
    %c0_41 = arith.constant 0 : index
    %40 = vector.load %arg11[%c0_39, %c0_40, %c0_41] : memref<9x1x32xf32, #tpu.memory_space<vmem>>, vector<9x1x32xf32>
    %c0_42 = arith.constant 0 : index
    %c0_43 = arith.constant 0 : index
    %c0_44 = arith.constant 0 : index
    %41 = vector.load %arg10[%c0_42, %c0_43, %c0_44] : memref<1x1x32xf32, #tpu.memory_space<vmem>>, vector<1x1x32xf32>
    %42 = vector.shape_cast %41 : vector<1x1x32xf32> to vector<1x1x32xf32>
    %43 = vector.broadcast %42 : vector<1x1x32xf32> to vector<8x16x32xf32>
    %c0_45 = arith.constant 0 : index
    %c0_46 = arith.constant 0 : index
    %c0_47 = arith.constant 0 : index
    %44 = vector.load %arg12[%c0_45, %c0_46, %c0_47] : memref<1x1x32xf32, #tpu.memory_space<vmem>>, vector<1x1x32xf32>
    %45 = vector.shape_cast %44 : vector<1x1x32xf32> to vector<1x1x32xf32>
    %46 = vector.broadcast %45 : vector<1x1x32xf32> to vector<8x16x32xf32>
    %c0_48 = arith.constant 0 : index
    %c7_49 = arith.constant 7 : index
    %c0_50 = arith.constant 0 : index
    %47 = vector.load %arg16[%c0_48, %c7_49, %c0_50] : memref<10x25x32xf32, #tpu.memory_space<vmem>>, vector<10x16x32xf32>
    %c0_51 = arith.constant 0 : index
    %c7_52 = arith.constant 7 : index
    %c0_53 = arith.constant 0 : index
    %48 = vector.load %arg17[%c0_51, %c7_52, %c0_53] : memref<10x25x32xf32, #tpu.memory_space<vmem>>, vector<10x16x32xf32>
    %49 = vector.extract_strided_slice %47 {offsets = [0, 0, 0], sizes = [8, 16, 32], strides = [1, 1, 1]} : vector<10x16x32xf32> to vector<8x16x32xf32>
    %50 = vector.extract_strided_slice %39 {offsets = [0, 0, 0], sizes = [1, 1, 32], strides = [1, 1, 1]} : vector<9x1x32xf32> to vector<1x1x32xf32>
    %51 = vector.shape_cast %50 : vector<1x1x32xf32> to vector<1x32xf32>
    %52 = vector.shape_cast %51 : vector<1x32xf32> to vector<1x1x32xf32>
    %53 = vector.broadcast %52 : vector<1x1x32xf32> to vector<8x16x32xf32>
    %54 = arith.mulf %49, %53 : vector<8x16x32xf32>
    %55 = arith.addf %43, %54 : vector<8x16x32xf32>
    %56 = vector.extract_strided_slice %48 {offsets = [0, 0, 0], sizes = [8, 16, 32], strides = [1, 1, 1]} : vector<10x16x32xf32> to vector<8x16x32xf32>
    %57 = vector.extract_strided_slice %40 {offsets = [0, 0, 0], sizes = [1, 1, 32], strides = [1, 1, 1]} : vector<9x1x32xf32> to vector<1x1x32xf32>
    %58 = vector.shape_cast %57 : vector<1x1x32xf32> to vector<1x32xf32>
    %59 = vector.shape_cast %58 : vector<1x32xf32> to vector<1x1x32xf32>
    %60 = vector.broadcast %59 : vector<1x1x32xf32> to vector<8x16x32xf32>
    %61 = arith.mulf %56, %60 : vector<8x16x32xf32>
    %62 = arith.addf %46, %61 : vector<8x16x32xf32>
    %63 = vector.extract_strided_slice %47 {offsets = [1, 0, 0], sizes = [8, 16, 32], strides = [1, 1, 1]} : vector<10x16x32xf32> to vector<8x16x32xf32>
    %64 = vector.extract_strided_slice %39 {offsets = [3, 0, 0], sizes = [1, 1, 32], strides = [1, 1, 1]} : vector<9x1x32xf32> to vector<1x1x32xf32>
    %65 = vector.shape_cast %64 : vector<1x1x32xf32> to vector<1x32xf32>
    %66 = vector.shape_cast %65 : vector<1x32xf32> to vector<1x1x32xf32>
    %67 = vector.broadcast %66 : vector<1x1x32xf32> to vector<8x16x32xf32>
    %68 = arith.mulf %63, %67 : vector<8x16x32xf32>
    %69 = arith.addf %55, %68 : vector<8x16x32xf32>
    %70 = vector.extract_strided_slice %48 {offsets = [1, 0, 0], sizes = [8, 16, 32], strides = [1, 1, 1]} : vector<10x16x32xf32> to vector<8x16x32xf32>
    %71 = vector.extract_strided_slice %40 {offsets = [3, 0, 0], sizes = [1, 1, 32], strides = [1, 1, 1]} : vector<9x1x32xf32> to vector<1x1x32xf32>
    %72 = vector.shape_cast %71 : vector<1x1x32xf32> to vector<1x32xf32>
    %73 = vector.shape_cast %72 : vector<1x32xf32> to vector<1x1x32xf32>
    %74 = vector.broadcast %73 : vector<1x1x32xf32> to vector<8x16x32xf32>
    %75 = arith.mulf %70, %74 : vector<8x16x32xf32>
    %76 = arith.addf %62, %75 : vector<8x16x32xf32>
    %77 = vector.extract_strided_slice %47 {offsets = [2, 0, 0], sizes = [8, 16, 32], strides = [1, 1, 1]} : vector<10x16x32xf32> to vector<8x16x32xf32>
    %78 = vector.extract_strided_slice %39 {offsets = [6, 0, 0], sizes = [1, 1, 32], strides = [1, 1, 1]} : vector<9x1x32xf32> to vector<1x1x32xf32>
    %79 = vector.shape_cast %78 : vector<1x1x32xf32> to vector<1x32xf32>
    %80 = vector.shape_cast %79 : vector<1x32xf32> to vector<1x1x32xf32>
    %81 = vector.broadcast %80 : vector<1x1x32xf32> to vector<8x16x32xf32>
    %82 = arith.mulf %77, %81 : vector<8x16x32xf32>
    %83 = arith.addf %69, %82 : vector<8x16x32xf32>
    %84 = vector.extract_strided_slice %48 {offsets = [2, 0, 0], sizes = [8, 16, 32], strides = [1, 1, 1]} : vector<10x16x32xf32> to vector<8x16x32xf32>
    %85 = vector.extract_strided_slice %40 {offsets = [6, 0, 0], sizes = [1, 1, 32], strides = [1, 1, 1]} : vector<9x1x32xf32> to vector<1x1x32xf32>
    %86 = vector.shape_cast %85 : vector<1x1x32xf32> to vector<1x32xf32>
    %87 = vector.shape_cast %86 : vector<1x32xf32> to vector<1x1x32xf32>
    %88 = vector.broadcast %87 : vector<1x1x32xf32> to vector<8x16x32xf32>
    %89 = arith.mulf %84, %88 : vector<8x16x32xf32>
    %90 = arith.addf %76, %89 : vector<8x16x32xf32>
    %c0_54 = arith.constant 0 : index
    %c8_55 = arith.constant 8 : index
    %c0_56 = arith.constant 0 : index
    %91 = vector.load %arg16[%c0_54, %c8_55, %c0_56] : memref<10x25x32xf32, #tpu.memory_space<vmem>>, vector<10x16x32xf32>
    %c0_57 = arith.constant 0 : index
    %c8_58 = arith.constant 8 : index
    %c0_59 = arith.constant 0 : index
    %92 = vector.load %arg17[%c0_57, %c8_58, %c0_59] : memref<10x25x32xf32, #tpu.memory_space<vmem>>, vector<10x16x32xf32>
    %93 = vector.extract_strided_slice %91 {offsets = [0, 0, 0], sizes = [8, 16, 32], strides = [1, 1, 1]} : vector<10x16x32xf32> to vector<8x16x32xf32>
    %94 = vector.extract_strided_slice %39 {offsets = [1, 0, 0], sizes = [1, 1, 32], strides = [1, 1, 1]} : vector<9x1x32xf32> to vector<1x1x32xf32>
    %95 = vector.shape_cast %94 : vector<1x1x32xf32> to vector<1x32xf32>
    %96 = vector.shape_cast %95 : vector<1x32xf32> to vector<1x1x32xf32>
    %97 = vector.broadcast %96 : vector<1x1x32xf32> to vector<8x16x32xf32>
    %98 = arith.mulf %93, %97 : vector<8x16x32xf32>
    %99 = arith.addf %83, %98 : vector<8x16x32xf32>
    %100 = vector.extract_strided_slice %92 {offsets = [0, 0, 0], sizes = [8, 16, 32], strides = [1, 1, 1]} : vector<10x16x32xf32> to vector<8x16x32xf32>
    %101 = vector.extract_strided_slice %40 {offsets = [1, 0, 0], sizes = [1, 1, 32], strides = [1, 1, 1]} : vector<9x1x32xf32> to vector<1x1x32xf32>
    %102 = vector.shape_cast %101 : vector<1x1x32xf32> to vector<1x32xf32>
    %103 = vector.shape_cast %102 : vector<1x32xf32> to vector<1x1x32xf32>
    %104 = vector.broadcast %103 : vector<1x1x32xf32> to vector<8x16x32xf32>
    %105 = arith.mulf %100, %104 : vector<8x16x32xf32>
    %106 = arith.addf %90, %105 : vector<8x16x32xf32>
    %107 = vector.extract_strided_slice %91 {offsets = [1, 0, 0], sizes = [8, 16, 32], strides = [1, 1, 1]} : vector<10x16x32xf32> to vector<8x16x32xf32>
    %108 = vector.extract_strided_slice %39 {offsets = [4, 0, 0], sizes = [1, 1, 32], strides = [1, 1, 1]} : vector<9x1x32xf32> to vector<1x1x32xf32>
    %109 = vector.shape_cast %108 : vector<1x1x32xf32> to vector<1x32xf32>
    %110 = vector.shape_cast %109 : vector<1x32xf32> to vector<1x1x32xf32>
    %111 = vector.broadcast %110 : vector<1x1x32xf32> to vector<8x16x32xf32>
    %112 = arith.mulf %107, %111 : vector<8x16x32xf32>
    %113 = arith.addf %99, %112 : vector<8x16x32xf32>
    %114 = vector.extract_strided_slice %92 {offsets = [1, 0, 0], sizes = [8, 16, 32], strides = [1, 1, 1]} : vector<10x16x32xf32> to vector<8x16x32xf32>
    %115 = vector.extract_strided_slice %40 {offsets = [4, 0, 0], sizes = [1, 1, 32], strides = [1, 1, 1]} : vector<9x1x32xf32> to vector<1x1x32xf32>
    %116 = vector.shape_cast %115 : vector<1x1x32xf32> to vector<1x32xf32>
    %117 = vector.shape_cast %116 : vector<1x32xf32> to vector<1x1x32xf32>
    %118 = vector.broadcast %117 : vector<1x1x32xf32> to vector<8x16x32xf32>
    %119 = arith.mulf %114, %118 : vector<8x16x32xf32>
    %120 = arith.addf %106, %119 : vector<8x16x32xf32>
    %121 = vector.extract_strided_slice %91 {offsets = [2, 0, 0], sizes = [8, 16, 32], strides = [1, 1, 1]} : vector<10x16x32xf32> to vector<8x16x32xf32>
    %122 = vector.extract_strided_slice %39 {offsets = [7, 0, 0], sizes = [1, 1, 32], strides = [1, 1, 1]} : vector<9x1x32xf32> to vector<1x1x32xf32>
    %123 = vector.shape_cast %122 : vector<1x1x32xf32> to vector<1x32xf32>
    %124 = vector.shape_cast %123 : vector<1x32xf32> to vector<1x1x32xf32>
    %125 = vector.broadcast %124 : vector<1x1x32xf32> to vector<8x16x32xf32>
    %126 = arith.mulf %121, %125 : vector<8x16x32xf32>
    %127 = arith.addf %113, %126 : vector<8x16x32xf32>
    %128 = vector.extract_strided_slice %92 {offsets = [2, 0, 0], sizes = [8, 16, 32], strides = [1, 1, 1]} : vector<10x16x32xf32> to vector<8x16x32xf32>
    %129 = vector.extract_strided_slice %40 {offsets = [7, 0, 0], sizes = [1, 1, 32], strides = [1, 1, 1]} : vector<9x1x32xf32> to vector<1x1x32xf32>
    %130 = vector.shape_cast %129 : vector<1x1x32xf32> to vector<1x32xf32>
    %131 = vector.shape_cast %130 : vector<1x32xf32> to vector<1x1x32xf32>
    %132 = vector.broadcast %131 : vector<1x1x32xf32> to vector<8x16x32xf32>
    %133 = arith.mulf %128, %132 : vector<8x16x32xf32>
    %134 = arith.addf %120, %133 : vector<8x16x32xf32>
    %c0_60 = arith.constant 0 : index
    %c9 = arith.constant 9 : index
    %c0_61 = arith.constant 0 : index
    %135 = vector.load %arg16[%c0_60, %c9, %c0_61] : memref<10x25x32xf32, #tpu.memory_space<vmem>>, vector<10x16x32xf32>
    %c0_62 = arith.constant 0 : index
    %c9_63 = arith.constant 9 : index
    %c0_64 = arith.constant 0 : index
    %136 = vector.load %arg17[%c0_62, %c9_63, %c0_64] : memref<10x25x32xf32, #tpu.memory_space<vmem>>, vector<10x16x32xf32>
    %137 = vector.extract_strided_slice %135 {offsets = [0, 0, 0], sizes = [8, 16, 32], strides = [1, 1, 1]} : vector<10x16x32xf32> to vector<8x16x32xf32>
    %138 = vector.extract_strided_slice %39 {offsets = [2, 0, 0], sizes = [1, 1, 32], strides = [1, 1, 1]} : vector<9x1x32xf32> to vector<1x1x32xf32>
    %139 = vector.shape_cast %138 : vector<1x1x32xf32> to vector<1x32xf32>
    %140 = vector.shape_cast %139 : vector<1x32xf32> to vector<1x1x32xf32>
    %141 = vector.broadcast %140 : vector<1x1x32xf32> to vector<8x16x32xf32>
    %142 = arith.mulf %137, %141 : vector<8x16x32xf32>
    %143 = arith.addf %127, %142 : vector<8x16x32xf32>
    %144 = vector.extract_strided_slice %136 {offsets = [0, 0, 0], sizes = [8, 16, 32], strides = [1, 1, 1]} : vector<10x16x32xf32> to vector<8x16x32xf32>
    %145 = vector.extract_strided_slice %40 {offsets = [2, 0, 0], sizes = [1, 1, 32], strides = [1, 1, 1]} : vector<9x1x32xf32> to vector<1x1x32xf32>
    %146 = vector.shape_cast %145 : vector<1x1x32xf32> to vector<1x32xf32>
    %147 = vector.shape_cast %146 : vector<1x32xf32> to vector<1x1x32xf32>
    %148 = vector.broadcast %147 : vector<1x1x32xf32> to vector<8x16x32xf32>
    %149 = arith.mulf %144, %148 : vector<8x16x32xf32>
    %150 = arith.addf %134, %149 : vector<8x16x32xf32>
    %151 = vector.extract_strided_slice %135 {offsets = [1, 0, 0], sizes = [8, 16, 32], strides = [1, 1, 1]} : vector<10x16x32xf32> to vector<8x16x32xf32>
    %152 = vector.extract_strided_slice %39 {offsets = [5, 0, 0], sizes = [1, 1, 32], strides = [1, 1, 1]} : vector<9x1x32xf32> to vector<1x1x32xf32>
    %153 = vector.shape_cast %152 : vector<1x1x32xf32> to vector<1x32xf32>
    %154 = vector.shape_cast %153 : vector<1x32xf32> to vector<1x1x32xf32>
    %155 = vector.broadcast %154 : vector<1x1x32xf32> to vector<8x16x32xf32>
    %156 = arith.mulf %151, %155 : vector<8x16x32xf32>
    %157 = arith.addf %143, %156 : vector<8x16x32xf32>
    %158 = vector.extract_strided_slice %136 {offsets = [1, 0, 0], sizes = [8, 16, 32], strides = [1, 1, 1]} : vector<10x16x32xf32> to vector<8x16x32xf32>
    %159 = vector.extract_strided_slice %40 {offsets = [5, 0, 0], sizes = [1, 1, 32], strides = [1, 1, 1]} : vector<9x1x32xf32> to vector<1x1x32xf32>
    %160 = vector.shape_cast %159 : vector<1x1x32xf32> to vector<1x32xf32>
    %161 = vector.shape_cast %160 : vector<1x32xf32> to vector<1x1x32xf32>
    %162 = vector.broadcast %161 : vector<1x1x32xf32> to vector<8x16x32xf32>
    %163 = arith.mulf %158, %162 : vector<8x16x32xf32>
    %164 = arith.addf %150, %163 : vector<8x16x32xf32>
    %165 = vector.extract_strided_slice %135 {offsets = [2, 0, 0], sizes = [8, 16, 32], strides = [1, 1, 1]} : vector<10x16x32xf32> to vector<8x16x32xf32>
    %166 = vector.extract_strided_slice %39 {offsets = [8, 0, 0], sizes = [1, 1, 32], strides = [1, 1, 1]} : vector<9x1x32xf32> to vector<1x1x32xf32>
    %167 = vector.shape_cast %166 : vector<1x1x32xf32> to vector<1x32xf32>
    %168 = vector.shape_cast %167 : vector<1x32xf32> to vector<1x1x32xf32>
    %169 = vector.broadcast %168 : vector<1x1x32xf32> to vector<8x16x32xf32>
    %170 = arith.mulf %165, %169 : vector<8x16x32xf32>
    %171 = arith.addf %157, %170 : vector<8x16x32xf32>
    %172 = vector.extract_strided_slice %136 {offsets = [2, 0, 0], sizes = [8, 16, 32], strides = [1, 1, 1]} : vector<10x16x32xf32> to vector<8x16x32xf32>
    %173 = vector.extract_strided_slice %40 {offsets = [8, 0, 0], sizes = [1, 1, 32], strides = [1, 1, 1]} : vector<9x1x32xf32> to vector<1x1x32xf32>
    %174 = vector.shape_cast %173 : vector<1x1x32xf32> to vector<1x32xf32>
    %175 = vector.shape_cast %174 : vector<1x32xf32> to vector<1x1x32xf32>
    %176 = vector.broadcast %175 : vector<1x1x32xf32> to vector<8x16x32xf32>
    %177 = arith.mulf %172, %176 : vector<8x16x32xf32>
    %178 = arith.addf %164, %177 : vector<8x16x32xf32>
    %cst_65 = arith.constant 5.000000e-01 : f32
    %179 = vector.broadcast %cst_65 : f32 to vector<8x16x32xf32>
    %180 = arith.mulf %179, %171 : vector<8x16x32xf32>
    %cst_66 = arith.constant 0.707106769 : f32
    %181 = vector.broadcast %cst_66 : f32 to vector<8x16x32xf32>
    %182 = arith.mulf %171, %181 : vector<8x16x32xf32>
    %183 = math.erf %182 : vector<8x16x32xf32>
    %cst_67 = arith.constant 1.000000e+00 : f32
    %184 = vector.broadcast %cst_67 : f32 to vector<8x16x32xf32>
    %185 = arith.addf %184, %183 : vector<8x16x32xf32>
    %186 = arith.mulf %180, %185 : vector<8x16x32xf32>
    %187 = arith.mulf %186, %178 : vector<8x16x32xf32>
    %188 = vector.shape_cast %187 : vector<8x16x32xf32> to vector<128x32xf32>
    %c0_68 = arith.constant 0 : index
    %c0_69 = arith.constant 0 : index
    %189 = vector.load %arg13[%c0_68, %c0_69] : memref<32x4xf32, #tpu.memory_space<vmem>>, vector<32x4xf32>
    %cst_70 = arith.constant dense<0.000000e+00> : vector<128x4xf32>
    %190 = tpu.matmul %188, %189, %cst_70 {dimension_numbers = #tpu.dot_dimension_numbers<[1], [0], [0], [1], [0, 0, 1, 1], [], []>} : vector<128x32xf32>, vector<32x4xf32>, vector<128x4xf32> -> vector<128x4xf32>
    %c0_71 = arith.constant 0 : index
    %c0_72 = arith.constant 0 : index
    %191 = vector.load %arg14[%c0_71, %c0_72] : memref<1x4xf32, #tpu.memory_space<vmem>>, vector<1x4xf32>
    %192 = vector.broadcast %191 : vector<1x4xf32> to vector<128x4xf32>
    %193 = arith.addf %190, %192 : vector<128x4xf32>
    %194 = vector.shape_cast %193 : vector<128x4xf32> to vector<8x16x4xf32>
    %c0_73 = arith.constant 0 : index
    %c0_74 = arith.constant 0 : index
    %c0_75 = arith.constant 0 : index
    %c0_76 = arith.constant 0 : index
    %195 = vector.load %arg15[%c0_73, %c0_74, %c0_75, %c0_76] : memref<1x8x16x4xf32, #tpu.memory_space<vmem>>, vector<1x8x16x4xf32>
    %196 = vector.shape_cast %195 : vector<1x8x16x4xf32> to vector<8x16x4xf32>
    %197 = vector.shape_cast %194 : vector<8x16x4xf32> to vector<1x8x16x4xf32>
    tpu.vector_store %arg15[%c0_73, %c0_74, %c0_75, %c0_76], %197 {strides = array<i32>} : memref<1x8x16x4xf32, #tpu.memory_space<vmem>>, vector<1x8x16x4xf32>,
    return
  }
  func.func @transform_0(%arg0: i32, %arg1: i32) -> (i32, i32, i32, i32) {
    %c0_i32 = arith.constant 0 : i32
    %c0_i32_0 = arith.constant 0 : i32
    %c0_i32_1 = arith.constant 0 : i32
    %c0_i32_2 = arith.constant 0 : i32
    return %arg0, %c0_i32, %c0_i32_0, %c0_i32_1 : i32, i32, i32, i32
  }
  func.func @transform_1(%arg0: i32, %arg1: i32) -> (i32, i32, i32, i32) {
    %c0_i32 = arith.constant 0 : i32
    %c0_i32_0 = arith.constant 0 : i32
    %c0_i32_1 = arith.constant 0 : i32
    %c0_i32_2 = arith.constant 0 : i32
    return %arg0, %c0_i32, %c0_i32_0, %c0_i32_1 : i32, i32, i32, i32
  }
  func.func @transform_2(%arg0: i32, %arg1: i32) -> (i32, i32) {
    %c0_i32 = arith.constant 0 : i32
    %c0_i32_0 = arith.constant 0 : i32
    %c0_i32_1 = arith.constant 0 : i32
    return %c0_i32, %c0_i32_0 : i32, i32
  }
  func.func @transform_3(%arg0: i32, %arg1: i32) -> (i32, i32) {
    %c0_i32 = arith.constant 0 : i32
    %c0_i32_0 = arith.constant 0 : i32
    %c0_i32_1 = arith.constant 0 : i32
    return %c0_i32, %c0_i32_0 : i32, i32
  }
  func.func @transform_4(%arg0: i32, %arg1: i32) -> (i32, i32) {
    %c0_i32 = arith.constant 0 : i32
    %c0_i32_0 = arith.constant 0 : i32
    %c0_i32_1 = arith.constant 0 : i32
    return %c0_i32, %c0_i32_0 : i32, i32
  }
  func.func @transform_5(%arg0: i32, %arg1: i32) -> (i32, i32) {
    %c0_i32 = arith.constant 0 : i32
    %c0_i32_0 = arith.constant 0 : i32
    %c0_i32_1 = arith.constant 0 : i32
    return %c0_i32, %c0_i32_0 : i32, i32
  }
  func.func @transform_6(%arg0: i32, %arg1: i32) -> (i32, i32) {
    %c0_i32 = arith.constant 0 : i32
    %c0_i32_0 = arith.constant 0 : i32
    %c0_i32_1 = arith.constant 0 : i32
    return %c0_i32, %c0_i32_0 : i32, i32
  }
  func.func @transform_7(%arg0: i32, %arg1: i32) -> (i32, i32, i32) {
    %c0_i32 = arith.constant 0 : i32
    %c0_i32_0 = arith.constant 0 : i32
    %c0_i32_1 = arith.constant 0 : i32
    %c0_i32_2 = arith.constant 0 : i32
    return %c0_i32, %c0_i32_0, %c0_i32_1 : i32, i32, i32
  }
  func.func @transform_8(%arg0: i32, %arg1: i32) -> (i32, i32, i32) {
    %c0_i32 = arith.constant 0 : i32
    %c0_i32_0 = arith.constant 0 : i32
    %c0_i32_1 = arith.constant 0 : i32
    %c0_i32_2 = arith.constant 0 : i32
    return %c0_i32, %c0_i32_0, %c0_i32_1 : i32, i32, i32
  }
  func.func @transform_9(%arg0: i32, %arg1: i32) -> (i32, i32, i32) {
    %c0_i32 = arith.constant 0 : i32
    %c0_i32_0 = arith.constant 0 : i32
    %c0_i32_1 = arith.constant 0 : i32
    %c0_i32_2 = arith.constant 0 : i32
    return %c0_i32, %c0_i32_0, %c0_i32_1 : i32, i32, i32
  }
  func.func @transform_10(%arg0: i32, %arg1: i32) -> (i32, i32, i32) {
    %c0_i32 = arith.constant 0 : i32
    %c0_i32_0 = arith.constant 0 : i32
    %c0_i32_1 = arith.constant 0 : i32
    %c0_i32_2 = arith.constant 0 : i32
    return %c0_i32, %c0_i32_0, %c0_i32_1 : i32, i32, i32
  }
  func.func @transform_11(%arg0: i32, %arg1: i32) -> (i32, i32) {
    %c0_i32 = arith.constant 0 : i32
    %c0_i32_0 = arith.constant 0 : i32
    %c0_i32_1 = arith.constant 0 : i32
    return %c0_i32, %c0_i32_0 : i32, i32
  }
  func.func @transform_12(%arg0: i32, %arg1: i32) -> (i32, i32) {
    %c0_i32 = arith.constant 0 : i32
    %c0_i32_0 = arith.constant 0 : i32
    %c0_i32_1 = arith.constant 0 : i32
    return %c0_i32, %c0_i32_0 : i32, i32
  }
  func.func @transform_13(%arg0: i32, %arg1: i32) -> (i32, i32, i32, i32) {
    %c0_i32 = arith.constant 0 : i32
    %c0_i32_0 = arith.constant 0 : i32
    %c0_i32_1 = arith.constant 0 : i32
    return %arg0, %arg1, %c0_i32, %c0_i32_0 : i32, i32, i32, i32
  }
}

</mosaic_0001>

<bundles_post_ra>
// kernel: tpu_custom_call.1
= control target key start
LH: loop header
LB: loop body
LE: loop exit
PB: predicated region body
PF: predicated region fallthrough
CT: control target
= control target key end

     0   :  { %s3121_s25 = smov 0   ;;  %s3123_s26 = smov 0   ;;  %s4515_s0 = inlined_call_operand.vmem [shape: f32[2,18,16,4], index: 0, kind: input, shape index: {}]   ;;  %s4516_s1 = inlined_call_operand.vmem [shape: f32[2,18,16,4], index: 1, kind: input, shape index: {}]   ;;  %s4517_s2 = inlined_call_operand.vmem [shape: f32[4,32], index: 2, kind: input, shape index: {}]   ;;  %s4518_s3 = inlined_call_operand.vmem [shape: f32[4,32], index: 3, kind: input, shape index: {}]   ;;  %s4519_s4 = inlined_call_operand.vmem [shape: f32[1,32], index: 4, kind: input, shape index: {}]   ;;  %s4520_s5 = inlined_call_operand.vmem [shape: f32[4,32], index: 5, kind: input, shape index: {}]   ;;  %s4521_s6 = inlined_call_operand.vmem [shape: f32[1,32], index: 6, kind: input, shape index: {}]   ;;  %s4522_s7 = inlined_call_operand.vmem [shape: f32[9,1,32], index: 7, kind: input, shape index: {}]   ;;  %s4523_s8 = inlined_call_operand.vmem [shape: f32[1,1,32], index: 8, kind: input, shape index: {}]   ;;  %s4524_s9 = inlined_call_operand.vmem [shape: f32[9,1,32], index: 9, kind: input, shape index: {}]   ;;  %s4525_s10 = inlined_call_operand.vmem [shape: f32[1,1,32], index: 10, kind: input, shape index: {}]   ;;  %s4526_s11 = inlined_call_operand.vmem [shape: f32[32,4], index: 11, kind: input, shape index: {}]   ;;  %s4527_s12 = inlined_call_operand.vmem [shape: f32[1,4], index: 12, kind: input, shape index: {}]   ;;  %s4528_s13 = inlined_call_operand.vmem [shape: f32[2,16,16,4], index: 13, kind: output, shape index: {}]  }
   0x1   :  { %4588 = sst [smem:[#allocation21_spill]] %s4517_s2  ;;  %s3125_s27 = smov 0  }
   0x2   :  { %4589 = sst [smem:[#allocation22_spill]] %s4518_s3  ;;  %s3127_s28 = smov 0  }
   0x3   :  { %4590 = sst [smem:[#allocation23_spill]] %s4520_s5  ;;  %s3129_s29 = smov 0  }
   0x4 LB: > { %s32_s30 = sadd.s32 1, %s3038_s27  ;;  %s35_s14 = sadd.s32 1, %s3042_s28  ;;  %s3046_s29 = sphi %s3129_s29, %s23_s29   ;;  %s3042_s28 = sphi %s3127_s28, %s4699_s28   ;;  %s3038_s27 = sphi %s3125_s27, %s4698_s27   ;;  %s3034_s26 = sphi %s3123_s26, %s4697_s26   ;;  %s3030_s25 = sphi %s3121_s25, %s4696_s25  }
   0x5   : > { %p33_p0 = scmp.ge.s32.totalorder %s32_s30, 2  ;;  %p2555_p1 = scmp.ge.s32.totalorder %s3046_s29, 1 }
   0x6   : > { %p411_p2 = scmp.lt.s32.totalorder %s3046_s29, 5 }
   0x7   : > { %s4701_s30 = smov (%p33_p0, %s32_s30), 0  ;;  %s4703_s14 = smov (!%p33_p0, %s35_s14), %s3042_s28 }
   0x8   : > { %p412_p3 = pnand %p2555_p1, %p411_p2  ;;  %p37_p4 = scmp.ge.s32.totalorder %s4703_s14, 2 }
   0xa   : > { %s4705_s14 = smov (%p37_p4, %s4703_s14), 0  ;;  %415 = sbr.rel (%p412_p3) target bundleno = 743 (0x2e7), region = 72 }
  0x11   : > { %s4591_s3 = sld [smem:[#allocation22_spill]]  ;;  %vm593_vm0 = vcmask 1043456   ;;  %p465_p5 = scmp.lt.s32.totalorder %s3034_s26, 1  ;;  %vm532_vm1 = vcmask 31744   ;;  %vm1234_vm2 = vcmask 253952   ;;  %v3048_v43 = vmov 0.0  }
  0x12   : > { %s2558_s17 = sshll.u32 %s3030_s25, 3  ;;  %s4592_s2 = sld [smem:[#allocation21_spill]]  ;;  %1235 = vst.msk [vmem:[#allocation2 + $0x7] sm:$0x1] %vm1234_vm2, %v3048_v43  ;;  %1236 = vst.msk [vmem:[#allocation2 + $0x27] sm:$0x1] %vm1234_vm2, %v3048_v43 }
  0x13   : > { %p478_p6 = scmp.lt.s32.totalorder %s2558_s17, 15  ;;  %s4593_s5 = sld [smem:[#allocation23_spill]]  ;;  %1237 = vst.msk [vmem:[#allocation2 + $0x47] sm:$0x1] %vm1234_vm2, %v3048_v43  ;;  %1238 = vst.msk [vmem:[#allocation2 + $0x67] sm:$0x1] %vm1234_vm2, %v3048_v43 }
  0x14   : > { %s4707_s26 = smov (!%p465_p5, %s3034_s26), 1  ;;  %s2670_s15 = sshll.u32 %s3030_s25, 7  ;;  %1239 = vst.msk [vmem:[#allocation2 + $0x87] sm:$0x1] %vm1234_vm2, %v3048_v43  ;;  %1240 = vst.msk [vmem:[#allocation2 + $0xa7] sm:$0x1] %vm1234_vm2, %v3048_v43 }
  0x15   : > { %s4709_s17 = smov (!%p478_p6, %s2558_s17), 15  ;;  %s2912_s22 = smul.u32 288, %s4707_s26  ;;  %1241 = vst.msk [vmem:[#allocation2 + $0xc7] sm:$0x1] %vm1234_vm2, %v3048_v43  ;;  %1242 = vst.msk [vmem:[#allocation2 + $0xe7] sm:$0x1] %vm1234_vm2, %v3048_v43 }
  0x16   : > { %s2560_s23 = sshll.u32 %s4707_s26, 5  ;;  %s2559_s24 = sshll.u32 %s4709_s17, 1  ;;  %1243 = vst.msk [vmem:[#allocation2 + $0x107] sm:$0x1] %vm1234_vm2, %v3048_v43  ;;  %1244 = vst.msk [vmem:[#allocation2 + $0x127] sm:$0x1] %vm1234_vm2, %v3048_v43 }
  0x17   : > { %v531_v0 = vld [vmem:[%s4591_s3] sm:$0xf]  ;;  %s474_s19 = scalar_lea.vmem %s4516_s1, %s2912_s22  ;;  %s482_s20 = sadd.s32 %s2560_s23, %s2559_s24  ;;  %1245 = vst.msk [vmem:[#allocation3 + $0x7] sm:$0x1] %vm1234_vm2, %v3048_v43  ;;  %1246 = vst.msk [vmem:[#allocation3 + $0x27] sm:$0x1] %vm1234_vm2, %v3048_v43 }
  0x18   : > { %2754 = vmatprep.subr.msk.mxu0 %vm593_vm0, %v531_v0  ;;  %v530_v1 = vld [vmem:[%s4592_s2] sm:$0xf]  ;;  %2890 = vmatprep.subr.msk.mxu1 %vm593_vm0, %v531_v0  ;;  %s2561_s21 = sshll.u32 %s482_s20, 3  ;;  %s3181_s2 = scalar_lea.vmem %s474_s19, %s2670_s15  ;;  %1247 = vst.msk [vmem:[#allocation3 + $0x47] sm:$0x1] %vm1234_vm2, %v3048_v43  ;;  %vm1193_vm3 = vcmask 261120  }
  0x19   : > { %v1017_v2 = vld [vmem:[%s4593_s5] sm:$0xf]  ;;  %2755 = vmatpush3.msk.msra.mxu0 %vm593_vm0, %v531_v0  ;;  %2891 = vmatpush3.msk.msra.mxu1 %vm593_vm0, %v531_v0  ;;  %s3186_s17 = scalar_lea.vmem %s4528_s13, %s2561_s21  ;;  %v511_v4 = vld [vmem:[%s3181_s2 + $0x8] sm:$0xff]  ;;  %v512_v5 = vld [vmem:[%s3181_s2 + $0x10] sm:$0xff]  ;;  %s469_s23 = scalar_lea.vmem %s4515_s0, %s2912_s22  ;;  %1248 = vst.msk [vmem:[#allocation3 + $0x67] sm:$0x1] %vm1234_vm2, %v3048_v43 }
  0x1a   : > { %2786 = vmatprep.subr.msk.mxu0 %vm593_vm0, %v530_v1  ;;  %2818 = vmatprep.subr.msk.mxu1 %vm593_vm0, %v1017_v2  ;;  %v510_v3 = vld [vmem:[%s3181_s2] sm:$0xff]  ;;  %v513_v6 = vld [vmem:[%s3181_s2 + $0x18] sm:$0xff]  ;;  %v3199_v8 = vld [vmem:[%s3181_s2 + $0x90] sm:$0xff]  ;;  %s3249_s24 = scalar_lea.vmem %s469_s23, %s2670_s15  ;;  %1249 = vst.msk [vmem:[#allocation3 + $0x87] sm:$0x1] %vm1234_vm2, %v3048_v43  ;;  %p2629_p7 = scmp.ne.s32.totalorder %s3030_s25, 0 }
  0x1b   : > { %2756 = vmatprep.mubr.msk.f32.mxu0 %vm532_vm1, %v510_v3  ;;  %v514_v7 = vld [vmem:[%s3181_s2 + $0x20] sm:$0xff]  ;;  %v3202_v9 = vld [vmem:[%s3181_s2 + $0x98] sm:$0xff]  ;;  %v515_v10 = vld [vmem:[%s3181_s2 + $0x28] sm:$0xff]  ;;  %2783 = vmatprep.mubr.msk.f32.mxu1 %vm532_vm1, %v3199_v8  ;;  %1250 = vst.msk [vmem:[#allocation3 + $0xa7] sm:$0x1] %vm1234_vm2, %v3048_v43 }
  0x1c   : > { %2757 = vmatmul.mubr.msk.f32.vlgmr.msra.gmra.mrb[0].mxu0 %vm532_vm1, %v511_v4  ;;  %v516_v11 = vld [vmem:[%s3181_s2 + $0x30] sm:$0xff]  ;;  %2784 = vmatmul.mubr.msk.f32.vlgmr.msra.gmra.mrb[0].mxu1 %vm532_vm1, %v3202_v9  ;;  %v517_v12 = vld [vmem:[%s3181_s2 + $0x38] sm:$0xff]  ;;  %v518_v13 = vld [vmem:[%s3181_s2 + $0x40] sm:$0xff]  ;;  %1251 = vst.msk [vmem:[#allocation3 + $0xc7] sm:$0x1] %vm1234_vm2, %v3048_v43 }
  0x1d   : > { %2787 = vmatpush3.msk.msra.mxu0 %vm593_vm0, %v530_v1  ;;  %2759 = vmatprep.mubr.msk.f32.mxu0 %vm532_vm1, %v512_v5  ;;  %v519_v14 = vld [vmem:[%s3181_s2 + $0x48] sm:$0xff]  ;;  %v520_v15 = vld [vmem:[%s3181_s2 + $0x50] sm:$0xff]  ;;  %v521_v16 = vld [vmem:[%s3181_s2 + $0x58] sm:$0xff]  ;;  %1252 = vst.msk [vmem:[#allocation3 + $0xe7] sm:$0x1] %vm1234_vm2, %v3048_v43 }
  0x1e   : > { %2819 = vmatpush3.msk.msra.mxu1 %vm593_vm0, %v1017_v2  ;;  %2820 = vmatprep.mubr.msk.f32.mxu1 %vm532_vm1, %v510_v3  ;;  %v522_v17 = vld [vmem:[%s3181_s2 + $0x60] sm:$0xff]  ;;  %v523_v18 = vld [vmem:[%s3181_s2 + $0x68] sm:$0xff]  ;;  %v524_v19 = vld [vmem:[%s3181_s2 + $0x70] sm:$0xff]  ;;  %1253 = vst.msk [vmem:[#allocation3 + $0x107] sm:$0x1] %vm1234_vm2, %v3048_v43 }
  0x1f   : > { %v525_v20 = vld [vmem:[%s3181_s2 + $0x78] sm:$0xff]  ;;  %v526_v21 = vld [vmem:[%s3181_s2 + $0x80] sm:$0xff]  ;;  %v527_v22 = vld [vmem:[%s3181_s2 + $0x88] sm:$0xff]  ;;  %1254 = vst.msk [vmem:[#allocation3 + $0x127] sm:$0x1] %vm1234_vm2, %v3048_v43 }
  0x20   : > { %2760 = vmatmul.mubr.msk.f32.gmra.mrb[2].mxu0 %vm532_vm1, %v513_v6  ;;  %2821 = vmatmul.mubr.msk.f32.vlgmr.msra.gmra.mrb[2].mxu1 %vm532_vm1, %v511_v4  ;;  %v489_v23 = vld [vmem:[%s3249_s24] sm:$0xff]  ;;  %v490_v24 = vld [vmem:[%s3249_s24 + $0x8] sm:$0xff]  ;;  %v491_v25 = vld [vmem:[%s3249_s24 + $0x10] sm:$0xff]  ;;  %1255 = vst.msk [vmem:[#allocation2 + $0x18] sm:$0x1] %vm1234_vm2, %v3048_v43 }
  0x21   : > { %2762 = vmatprep.mubr.msk.f32.mxu0 %vm532_vm1, %v514_v7  ;;  %2823 = vmatprep.mubr.msk.f32.mxu1 %vm532_vm1, %v512_v5  ;;  %v492_v26 = vld [vmem:[%s3249_s24 + $0x18] sm:$0xff]  ;;  %v493_v27 = vld [vmem:[%s3249_s24 + $0x20] sm:$0xff]  ;;  %v494_v28 = vld [vmem:[%s3249_s24 + $0x28] sm:$0xff]  ;;  %1256 = vst.msk [vmem:[#allocation2 + $0x38] sm:$0x1] %vm1234_vm2, %v3048_v43 }
  0x22   : > { %v495_v29 = vld [vmem:[%s3249_s24 + $0x30] sm:$0xff]  ;;  %v496_v30 = vld [vmem:[%s3249_s24 + $0x38] sm:$0xff]  ;;  %v497_v31 = vld [vmem:[%s3249_s24 + $0x40] sm:$0xff]  ;;  %1257 = vst.msk [vmem:[#allocation2 + $0x58] sm:$0x1] %vm1234_vm2, %v3048_v43 }
  0x23   : > { %v498_v32 = vld [vmem:[%s3249_s24 + $0x48] sm:$0xff]  ;;  %v499_v33 = vld [vmem:[%s3249_s24 + $0x50] sm:$0xff]  ;;  %v500_v34 = vld [vmem:[%s3249_s24 + $0x58] sm:$0xff]  ;;  %1258 = vst.msk [vmem:[#allocation2 + $0x78] sm:$0x1] %vm1234_vm2, %v3048_v43 }
  0x24   : > { %2763 = vmatmul.mubr.msk.f32.gmra.mrb[4].mxu0 %vm532_vm1, %v515_v10  ;;  %2824 = vmatmul.mubr.msk.f32.gmra.mrb[4].mxu1 %vm532_vm1, %v513_v6  ;;  %v501_v35 = vld [vmem:[%s3249_s24 + $0x60] sm:$0xff]  ;;  %v502_v36 = vld [vmem:[%s3249_s24 + $0x68] sm:$0xff]  ;;  %v503_v37 = vld [vmem:[%s3249_s24 + $0x70] sm:$0xff]  ;;  %1259 = vst.msk [vmem:[#allocation2 + $0x98] sm:$0x1] %vm1234_vm2, %v3048_v43 }
  0x25   : > { %2765 = vmatprep.mubr.msk.f32.mxu0 %vm532_vm1, %v516_v11  ;;  %2826 = vmatprep.mubr.msk.f32.mxu1 %vm532_vm1, %v514_v7  ;;  %v504_v38 = vld [vmem:[%s3249_s24 + $0x78] sm:$0xff]  ;;  %v505_v39 = vld [vmem:[%s3249_s24 + $0x80] sm:$0xff]  ;;  %v506_v40 = vld [vmem:[%s3249_s24 + $0x88] sm:$0xff]  ;;  %1260 = vst.msk [vmem:[#allocation2 + $0xb8] sm:$0x1] %vm1234_vm2, %v3048_v43 }
  0x26   : > { %v507_v41 = vld [vmem:[%s3249_s24 + $0x90] sm:$0xff]  ;;  %v508_v42 = vld [vmem:[%s3249_s24 + $0x98] sm:$0xff]  ;;  %1261 = vst.msk [vmem:[#allocation2 + $0xd8] sm:$0x1] %vm1234_vm2, %v3048_v43  ;;  %1262 = vst.msk [vmem:[#allocation2 + $0xf8] sm:$0x1] %vm1234_vm2, %v3048_v43 }
  0x27   : > { %1263 = vst.msk [vmem:[#allocation2 + $0x118] sm:$0x1] %vm1234_vm2, %v3048_v43  ;;  %1264 = vst.msk [vmem:[#allocation2 + $0x138] sm:$0x1] %vm1234_vm2, %v3048_v43  ;;  %v3354_v46 = vld [vmem:[%s4521_s6] ss:$0 sm:$0xff] }
  0x28   : > { %2766 = vmatmul.mubr.msk.f32.gmra.mrb[6].mxu0 %vm532_vm1, %v517_v12  ;;  %2827 = vmatmul.mubr.msk.f32.gmra.mrb[6].mxu1 %vm532_vm1, %v515_v10  ;;  %1265 = vst.msk [vmem:[#allocation3 + $0x18] sm:$0x1] %vm1234_vm2, %v3048_v43  ;;  %1266 = vst.msk [vmem:[#allocation3 + $0x38] sm:$0x1] %vm1234_vm2, %v3048_v43  ;;  %v3382_v7 = vld [vmem:[%s4519_s4] ss:$0 sm:$0xff] }
  0x29   : > { %2768 = vmatprep.mubr.msk.f32.mxu0 %vm532_vm1, %v518_v13  ;;  %2829 = vmatprep.mubr.msk.f32.mxu1 %vm532_vm1, %v516_v11  ;;  %1267 = vst.msk [vmem:[#allocation3 + $0x58] sm:$0x1] %vm1234_vm2, %v3048_v43  ;;  %1268 = vst.msk [vmem:[#allocation3 + $0x78] sm:$0x1] %vm1234_vm2, %v3048_v43 }
  0x2a   : > { %1269 = vst.msk [vmem:[#allocation3 + $0x98] sm:$0x1] %vm1234_vm2, %v3048_v43  ;;  %1270 = vst.msk [vmem:[#allocation3 + $0xb8] sm:$0x1] %vm1234_vm2, %v3048_v43 }
  0x2b   : > { %1271 = vst.msk [vmem:[#allocation3 + $0xd8] sm:$0x1] %vm1234_vm2, %v3048_v43  ;;  %1272 = vst.msk [vmem:[#allocation3 + $0xf8] sm:$0x1] %vm1234_vm2, %v3048_v43 }
  0x2c   : > { %2769 = vmatmul.mubr.msk.f32.gmra.mrb[8].mxu0 %vm532_vm1, %v519_v14  ;;  %2830 = vmatmul.mubr.msk.f32.gmra.mrb[8].mxu1 %vm532_vm1, %v517_v12  ;;  %1273 = vst.msk [vmem:[#allocation3 + $0x118] sm:$0x1] %vm1234_vm2, %v3048_v43  ;;  %1274 = vst.msk [vmem:[#allocation3 + $0x138] sm:$0x1] %vm1234_vm2, %v3048_v43 }
  0x2d   : > { %2771 = vmatprep.mubr.msk.f32.mxu0 %vm532_vm1, %v520_v15  ;;  %2832 = vmatprep.mubr.msk.f32.mxu1 %vm532_vm1, %v518_v13 }
  0x30   : > { %2772 = vmatmul.mubr.msk.f32.gmra.mrb[10].mxu0 %vm532_vm1, %v521_v16  ;;  %2833 = vmatmul.mubr.msk.f32.gmra.mrb[10].mxu1 %vm532_vm1, %v519_v14 }
  0x31   : > { %2774 = vmatprep.mubr.msk.f32.mxu0 %vm532_vm1, %v522_v17  ;;  %2835 = vmatprep.mubr.msk.f32.mxu1 %vm532_vm1, %v520_v15 }
  0x34   : > { %2775 = vmatmul.mubr.msk.f32.gmra.mrb[12].mxu0 %vm532_vm1, %v523_v18  ;;  %2836 = vmatmul.mubr.msk.f32.gmra.mrb[12].mxu1 %vm532_vm1, %v521_v16 }
  0x35   : > { %2777 = vmatprep.mubr.msk.f32.mxu0 %vm532_vm1, %v524_v19  ;;  %2838 = vmatprep.mubr.msk.f32.mxu1 %vm532_vm1, %v522_v17 }
  0x38   : > { %2778 = vmatmul.mubr.msk.f32.gmra.mrb[14].mxu0 %vm532_vm1, %v525_v20  ;;  %2839 = vmatmul.mubr.msk.f32.gmra.mrb[14].mxu1 %vm532_vm1, %v523_v18 }
  0x39   : > { %2780 = vmatprep.mubr.msk.f32.mxu0 %vm532_vm1, %v526_v21  ;;  %2841 = vmatprep.mubr.msk.f32.mxu1 %vm532_vm1, %v524_v19 }
  0x3c   : > { %2781 = vmatmul.mubr.msk.f32.gmra.mrb[16].mxu0 %vm532_vm1, %v527_v22  ;;  %2842 = vmatmul.mubr.msk.f32.gmra.mrb[16].mxu1 %vm532_vm1, %v525_v20 }
  0x3d   : > { %2788 = vmatprep.mubr.msk.f32.mxu0 %vm532_vm1, %v489_v23  ;;  %2844 = vmatprep.mubr.msk.f32.mxu1 %vm532_vm1, %v526_v21 }
  0x40   : > { %2789 = vmatmul.mubr.msk.f32.vlgmr.msra.gmra.mrb[0].mxu0 %vm532_vm1, %v490_v24  ;;  %2845 = vmatmul.mubr.msk.f32.gmra.mrb[18].mxu1 %vm532_vm1, %v527_v22 }
  0x41   : > { %2791 = vmatprep.mubr.msk.f32.mxu0 %vm532_vm1, %v491_v25  ;;  %2847 = vmatprep.mubr.msk.f32.mxu1 %vm532_vm1, %v3199_v8 }
  0x44   : > { %2792 = vmatmul.mubr.msk.f32.gmra.mrb[2].mxu0 %vm532_vm1, %v492_v26  ;;  %2848 = vmatmul.mubr.msk.f32.gmra.mrb[20].mxu1 %vm532_vm1, %v3202_v9 }
  0x45   : > { %2794 = vmatprep.mubr.msk.f32.mxu0 %vm532_vm1, %v493_v27 }
  0x48   : > { %2795 = vmatmul.mubr.msk.f32.gmra.mrb[4].mxu0 %vm532_vm1, %v494_v28 }
  0x49   : > { %2797 = vmatprep.mubr.msk.f32.mxu0 %vm532_vm1, %v495_v29 }
  0x4c   : > { %2798 = vmatmul.mubr.msk.f32.gmra.mrb[6].mxu0 %vm532_vm1, %v496_v30 }
  0x4d   : > { %2800 = vmatprep.mubr.msk.f32.mxu0 %vm532_vm1, %v497_v31 }
  0x50   : > { %2801 = vmatmul.mubr.msk.f32.gmra.mrb[8].mxu0 %vm532_vm1, %v498_v32 }
  0x51   : > { %2803 = vmatprep.mubr.msk.f32.mxu0 %vm532_vm1, %v499_v33 }
  0x54   : > { %2804 = vmatmul.mubr.msk.f32.gmra.mrb[10].mxu0 %vm532_vm1, %v500_v34 }
  0x55   : > { %2806 = vmatprep.mubr.msk.f32.mxu0 %vm532_vm1, %v501_v35 }
  0x58   : > { %2807 = vmatmul.mubr.msk.f32.gmra.mrb[12].mxu0 %vm532_vm1, %v502_v36 }
  0x59   : > { %2809 = vmatprep.mubr.msk.f32.mxu0 %vm532_vm1, %v503_v37 }
  0x5c   : > { %2810 = vmatmul.mubr.msk.f32.gmra.mrb[14].mxu0 %vm532_vm1, %v504_v38 }
  0x5d   : > { %2812 = vmatprep.mubr.msk.f32.mxu0 %vm532_vm1, %v505_v39 }
  0x60   : > { %2813 = vmatmul.mubr.msk.f32.gmra.mrb[16].mxu0 %vm532_vm1, %v506_v40 }
  0x61   : > { %2815 = vmatprep.mubr.msk.f32.mxu0 %vm532_vm1, %v507_v41 }
  0x64   : > { %2816 = vmatmul.mubr.msk.f32.gmra.mrb[18].mxu0 %vm532_vm1, %v508_v42 }
  0xef   : > { %v3347_v44 = vpop.f32.mrb[0].mxu1 }
  0xf0   : > { %v3349_v45 = vpop.f32.mrb[1].mxu1 }
  0xf3   : > { %v2822_v47 = vpop.f32.mrb[2].mxu1 }
  0xf4   : > { %v1100_v48 = vadd.f32 %v2822_v47, %v3354_v46  ;;  %v1094_v49 = vpop.f32.mrb[3].mxu1 }
  0xf5   : > { %v1095_v50 = vadd.f32 %v3354_v46, %v1094_v49 }
  0xf6   : > { %1215 = vst.msk [vmem:[#allocation3 + $0x10] sm:$0xff] %vm1193_vm3, %v1100_v48 }
  0xf7   : > { %1214 = vst.msk [vmem:[#allocation3 + $0x8] sm:$0xff] %vm1193_vm3, %v1095_v50  ;;  %v2825_v51 = vpop.f32.mrb[4].mxu1 }
  0xf8   : > { %v1110_v52 = vadd.f32 %v2825_v51, %v3354_v46  ;;  %v1104_v53 = vpop.f32.mrb[5].mxu1 }
  0xf9   : > { %v1105_v54 = vadd.f32 %v3354_v46, %v1104_v53 }
  0xfa   : > { %1217 = vst.msk [vmem:[#allocation3 + $0x30] sm:$0xff] %vm1193_vm3, %v1110_v52 }
  0xfb   : > { %1216 = vst.msk [vmem:[#allocation3 + $0x28] sm:$0xff] %vm1193_vm3, %v1105_v54  ;;  %v2828_v55 = vpop.f32.mrb[6].mxu1 }
  0xfc   : > { %v1120_v56 = vadd.f32 %v2828_v55, %v3354_v46  ;;  %v1114_v57 = vpop.f32.mrb[7].mxu1 }
  0xfd   : > { %v1115_v58 = vadd.f32 %v3354_v46, %v1114_v57 }
  0xfe   : > { %1219 = vst.msk [vmem:[#allocation3 + $0x50] sm:$0xff] %vm1193_vm3, %v1120_v56 }
  0xff   : > { %1218 = vst.msk [vmem:[#allocation3 + $0x48] sm:$0xff] %vm1193_vm3, %v1115_v58  ;;  %v2831_v59 = vpop.f32.mrb[8].mxu1 }
 0x100   : > { %v1130_v60 = vadd.f32 %v2831_v59, %v3354_v46  ;;  %v1124_v61 = vpop.f32.mrb[9].mxu1 }
 0x101   : > { %v1125_v62 = vadd.f32 %v3354_v46, %v1124_v61 }
 0x102   : > { %1221 = vst.msk [vmem:[#allocation3 + $0x70] sm:$0xff] %vm1193_vm3, %v1130_v60 }
 0x103   : > { %1220 = vst.msk [vmem:[#allocation3 + $0x68] sm:$0xff] %vm1193_vm3, %v1125_v62  ;;  %v2834_v63 = vpop.f32.mrb[10].mxu1 }
 0x104   : > { %v1140_v0 = vadd.f32 %v2834_v63, %v3354_v46  ;;  %v1134_v1 = vpop.f32.mrb[11].mxu1 }
 0x105   : > { %v1135_v2 = vadd.f32 %v3354_v46, %v1134_v1 }
 0x106   : > { %1223 = vst.msk [vmem:[#allocation3 + $0x90] sm:$0xff] %vm1193_vm3, %v1140_v0 }
 0x107   : > { %1222 = vst.msk [vmem:[#allocation3 + $0x88] sm:$0xff] %vm1193_vm3, %v1135_v2  ;;  %v2837_v3 = vpop.f32.mrb[12].mxu1 }
 0x108   : > { %v1150_v4 = vadd.f32 %v2837_v3, %v3354_v46  ;;  %v1144_v5 = vpop.f32.mrb[13].mxu1 }
 0x109   : > { %v1145_v6 = vadd.f32 %v3354_v46, %v1144_v5 }
 0x10a   : > { %1225 = vst.msk [vmem:[#allocation3 + $0xb0] sm:$0xff] %vm1193_vm3, %v1150_v4  ;;  %v3049_v4 = vmov (!%p2629_p7), 0.0  }
 0x10b   : > { %1224 = vst.msk [vmem:[#allocation3 + $0xa8] sm:$0xff] %vm1193_vm3, %v1145_v6  ;;  %v2840_v8 = vpop.f32.mrb[14].mxu1  ;;  %1281 = vst.msk [vmem:[#allocation3 + $0x8] sm:$0xff] (!%p2629_p7), %vm1193_vm3, %v3049_v4 }
 0x10c   : > { %v1160_v9 = vadd.f32 %v2840_v8, %v3354_v46  ;;  %v1154_v10 = vpop.f32.mrb[15].mxu1  ;;  %1282 = vst.msk [vmem:[#allocation3 + $0x10] sm:$0xff] (!%p2629_p7), %vm1193_vm3, %v3049_v4 }
 0x10d   : > { %v1155_v12 = vadd.f32 %v3354_v46, %v1154_v10 }
 0x10e   : > { %1227 = vst.msk [vmem:[#allocation3 + $0xd0] sm:$0xff] %vm1193_vm3, %v1160_v9 }
 0x10f   : > { %1226 = vst.msk [vmem:[#allocation3 + $0xc8] sm:$0xff] %vm1193_vm3, %v1155_v12  ;;  %v2843_v16 = vpop.f32.mrb[16].mxu1 }
 0x110   : > { %v1170_v17 = vadd.f32 %v2843_v16, %v3354_v46  ;;  %v1164_v18 = vpop.f32.mrb[17].mxu1 }
 0x111   : > { %v1165_v20 = vadd.f32 %v3354_v46, %v1164_v18 }
 0x112   : > { %1229 = vst.msk [vmem:[#allocation3 + $0xf0] sm:$0xff] %vm1193_vm3, %v1170_v17 }
 0x113   : > { %v2790_v11 = vpop.f32.mrb[0].mxu0  ;;  %1228 = vst.msk [vmem:[#allocation3 + $0xe8] sm:$0xff] %vm1193_vm3, %v1165_v20  ;;  %v2846_v24 = vpop.f32.mrb[18].mxu1 }
 0x114   : > { %v998_v13 = vadd.f32 %v2790_v11, %v3382_v7  ;;  %v891_v14 = vpop.f32.mrb[1].mxu0  ;;  %v1180_v25 = vadd.f32 %v2846_v24, %v3354_v46  ;;  %v1174_v26 = vpop.f32.mrb[19].mxu1 }
 0x115   : > { %v997_v15 = vadd.f32 %v3382_v7, %v891_v14  ;;  %v1175_v28 = vadd.f32 %v3354_v46, %v1174_v26 }
 0x116   : > { %1195 = vst.msk [vmem:[#allocation2 + $0x10] sm:$0xff] %vm1193_vm3, %v998_v13  ;;  %1231 = vst.msk [vmem:[#allocation3 + $0x110] sm:$0xff] %vm1193_vm3, %v1180_v25 }
 0x117   : > { %1194 = vst.msk [vmem:[#allocation2 + $0x8] sm:$0xff] %vm1193_vm3, %v997_v15  ;;  %v2793_v19 = vpop.f32.mrb[2].mxu0  ;;  %1230 = vst.msk [vmem:[#allocation3 + $0x108] sm:$0xff] %vm1193_vm3, %v1175_v28  ;;  %v2849_v32 = vpop.f32.mrb[20].mxu1 }
 0x118   : > { %v1000_v21 = vadd.f32 %v2793_v19, %v3382_v7  ;;  %v901_v22 = vpop.f32.mrb[3].mxu0  ;;  %v1190_v33 = vadd.f32 %v2849_v32, %v3354_v46  ;;  %v1184_v34 = vpop.f32.mrb[21].mxu1  ;;  %1279 = vst.msk [vmem:[#allocation2 + $0x8] sm:$0xff] (!%p2629_p7), %vm1193_vm3, %v3049_v4  ;;  %1280 = vst.msk [vmem:[#allocation2 + $0x10] sm:$0xff] (!%p2629_p7), %vm1193_vm3, %v3049_v4 }
 0x119   : > { %v999_v23 = vadd.f32 %v3382_v7, %v901_v22  ;;  %v1185_v36 = vadd.f32 %v3354_v46, %v1184_v34 }
 0x11a   : > { %1197 = vst.msk [vmem:[#allocation2 + $0x30] sm:$0xff] %vm1193_vm3, %v1000_v21  ;;  %1233 = vst.msk [vmem:[#allocation3 + $0x130] sm:$0xff] %vm1193_vm3, %v1190_v33 }
 0x11b   : > { %1196 = vst.msk [vmem:[#allocation2 + $0x28] sm:$0xff] %vm1193_vm3, %v999_v23  ;;  %v2796_v27 = vpop.f32.mrb[4].mxu0  ;;  %1232 = vst.msk [vmem:[#allocation3 + $0x128] sm:$0xff] %vm1193_vm3, %v1185_v36 }
 0x11c   : > { %v1002_v29 = vadd.f32 %v2796_v27, %v3382_v7  ;;  %v911_v30 = vpop.f32.mrb[5].mxu0 }
 0x11d   : > { %v1001_v31 = vadd.f32 %v3382_v7, %v911_v30 }
 0x11e   : > { %1199 = vst.msk [vmem:[#allocation2 + $0x50] sm:$0xff] %vm1193_vm3, %v1002_v29 }
 0x11f   : > { %1198 = vst.msk [vmem:[#allocation2 + $0x48] sm:$0xff] %vm1193_vm3, %v1001_v31  ;;  %v2799_v35 = vpop.f32.mrb[6].mxu0 }
 0x120   : > { %v1004_v37 = vadd.f32 %v2799_v35, %v3382_v7  ;;  %v921_v38 = vpop.f32.mrb[7].mxu0 }
 0x121   : > { %v1003_v39 = vadd.f32 %v3382_v7, %v921_v38 }
 0x122   : > { %1201 = vst.msk [vmem:[#allocation2 + $0x70] sm:$0xff] %vm1193_vm3, %v1004_v37 }
 0x123   : > { %1200 = vst.msk [vmem:[#allocation2 + $0x68] sm:$0xff] %vm1193_vm3, %v1003_v39  ;;  %v2802_v40 = vpop.f32.mrb[8].mxu0 }
 0x124   : > { %v1006_v41 = vadd.f32 %v2802_v40, %v3382_v7  ;;  %v931_v42 = vpop.f32.mrb[9].mxu0 }
 0x125   : > { %v1005_v43 = vadd.f32 %v3382_v7, %v931_v42 }
 0x126   : > { %1203 = vst.msk [vmem:[#allocation2 + $0x90] sm:$0xff] %vm1193_vm3, %v1006_v41 }
 0x127   : > { %1202 = vst.msk [vmem:[#allocation2 + $0x88] sm:$0xff] %vm1193_vm3, %v1005_v43  ;;  %v2805_v46 = vpop.f32.mrb[10].mxu0 }
 0x128   : > { %v1008_v47 = vadd.f32 %v2805_v46, %v3382_v7  ;;  %v941_v48 = vpop.f32.mrb[11].mxu0 }
 0x129   : > { %v1007_v49 = vadd.f32 %v3382_v7, %v941_v48 }
 0x12a   : > { %1205 = vst.msk [vmem:[#allocation2 + $0xb0] sm:$0xff] %vm1193_vm3, %v1008_v47 }
 0x12b   : > { %1204 = vst.msk [vmem:[#allocation2 + $0xa8] sm:$0xff] %vm1193_vm3, %v1007_v49  ;;  %v2808_v50 = vpop.f32.mrb[12].mxu0 }
 0x12c   : > { %v1010_v51 = vadd.f32 %v2808_v50, %v3382_v7  ;;  %v951_v52 = vpop.f32.mrb[13].mxu0 }
 0x12d   : > { %v1009_v53 = vadd.f32 %v3382_v7, %v951_v52 }
 0x12e   : > { %1207 = vst.msk [vmem:[#allocation2 + $0xd0] sm:$0xff] %vm1193_vm3, %v1010_v51 }
 0x12f   : > { %1206 = vst.msk [vmem:[#allocation2 + $0xc8] sm:$0xff] %vm1193_vm3, %v1009_v53  ;;  %v2811_v54 = vpop.f32.mrb[14].mxu0 }
 0x130   : > { %v1012_v55 = vadd.f32 %v2811_v54, %v3382_v7  ;;  %v961_v56 = vpop.f32.mrb[15].mxu0 }
 0x131   : > { %v1011_v57 = vadd.f32 %v3382_v7, %v961_v56 }
 0x132   : > { %1209 = vst.msk [vmem:[#allocation2 + $0xf0] sm:$0xff] %vm1193_vm3, %v1012_v55 }
 0x133   : > { %1208 = vst.msk [vmem:[#allocation2 + $0xe8] sm:$0xff] %vm1193_vm3, %v1011_v57  ;;  %v2814_v58 = vpop.f32.mrb[16].mxu0 }
 0x134   : > { %v1014_v59 = vadd.f32 %v2814_v58, %v3382_v7  ;;  %v971_v60 = vpop.f32.mrb[17].mxu0 }
 0x135   : > { %v1013_v61 = vadd.f32 %v3382_v7, %v971_v60 }
 0x136   : > { %1211 = vst.msk [vmem:[#allocation2 + $0x110] sm:$0xff] %vm1193_vm3, %v1014_v59 }
 0x137   : > { %1210 = vst.msk [vmem:[#allocation2 + $0x108] sm:$0xff] %vm1193_vm3, %v1013_v61  ;;  %v2817_v62 = vpop.f32.mrb[18].mxu0  ;;  %1278 = sbr.rel (%p2629_p7) target bundleno = 318 (0x13e), region = 76 }
 0x138   : > { %v987_v63 = vadd.f32 %v2817_v62, %v3347_v44  ;;  %v981_v0 = vpop.f32.mrb[19].mxu0 }
 0x139   : > { %v982_v1 = vadd.f32 %v981_v0, %v3349_v45 }
 0x13a   : > { %v1016_v2 = vadd.f32 %v3382_v7, %v987_v63 }
 0x13b   : > { %v1015_v3 = vadd.f32 %v3382_v7, %v982_v1 }
 0x13c   : > { %1213 = vst.msk [vmem:[#allocation2 + $0x130] sm:$0xff] %vm1193_vm3, %v1016_v2 }
 0x13d   : > { %1212 = vst.msk [vmem:[#allocation2 + $0x128] sm:$0xff] %vm1193_vm3, %v1015_v3 }
 0x13e PF: > { %p2630_p8 = scmp.ne.s32.totalorder %s3030_s25, 1 }
 0x13f   : > { %v3050_v44 = vmov (!%p2630_p8), 0.0  }
 0x140   : > { %1286 = sbr.rel (%p2630_p8) target bundleno = 327 (0x147), region = 80  ;;  %1288 = vst.msk [vmem:[#allocation2 + $0x128] sm:$0xff] (!%p2630_p8), %vm1193_vm3, %v3050_v44  ;;  %1289 = vst.msk [vmem:[#allocation2 + $0x130] sm:$0xff] (!%p2630_p8), %vm1193_vm3, %v3050_v44 }
 0x141   : > { %1291 = vst.msk [vmem:[#allocation3 + $0x128] sm:$0xff] (!%p2630_p8), %vm1193_vm3, %v3050_v44  ;;  %1292 = vst.msk [vmem:[#allocation3 + $0x130] sm:$0xff] (!%p2630_p8), %vm1193_vm3, %v3050_v44 }
 0x147 PF: > { %v2225_v45 = vld [vmem:[%s4526_s11] sm:$0xff]  ;;  %v2226_v5 = vld [vmem:[%s4526_s11 + $0x8] sm:$0xff]  ;;  %v2227_v6 = vld [vmem:[%s4526_s11 + $0x10] sm:$0xff] }
 0x148   : > { %v2882_v7 = vpack.c.bf16 %v2226_v5, %v2225_v45  ;;  %v2228_v8 = vld [vmem:[%s4526_s11 + $0x18] sm:$0xff]  ;;  %v3468_v10 = vld [vmem:[%s4522_s7] ss:$0 sm:$0xff]  ;;  %v3473_v11 = vld [vmem:[%s4522_s7 + $0x3] ss:$0 sm:$0xff] }
 0x149   : > { %v2886_v9 = vpack.c.bf16 %v2228_v8, %v2227_v6  ;;  %v3478_v12 = vld [vmem:[%s4522_s7 + $0x6] ss:$0 sm:$0xff]  ;;  %v3483_v13 = vld [vmem:[%s4524_s9] ss:$0 sm:$0xff]  ;;  %v3488_v14 = vld [vmem:[%s4524_s9 + $0x3] ss:$0 sm:$0xff] }
 0x14a   : > { %2883 = vmatprep.subr.bf16.mxu1 %v2882_v7  ;;  %v3493_v15 = vld [vmem:[%s4524_s9 + $0x6] ss:$0 sm:$0xff]  ;;  %v3498_v16 = vld [vmem:[%s4523_s8] ss:$0 sm:$0xff]  ;;  %v1325_v18 = vld [vmem:[#allocation2 + $0x7] sm:$0xff] }
 0x14b   : > { %2885 = vmatpush3.bf16.msra.mxu1 %v2882_v7  ;;  %v3503_v17 = vld [vmem:[%s4525_s10] ss:$0 sm:$0xff]  ;;  %v1327_v19 = vld [vmem:[#allocation2 + $0x27] sm:$0xff]  ;;  %v1371_v24 = vmul.f32 %v3468_v10, %v1325_v18  ;;  %v3510_v26 = vld [vmem:[%s4522_s7 + $0x1] ss:$0 sm:$0xff] }
 0x14c   : > { %2887 = vmatprep.subr.bf16.mxu1 %v2886_v9  ;;  %v1329_v20 = vld [vmem:[#allocation2 + $0x47] sm:$0xff]  ;;  %v1447_v25 = vmul.f32 %v3473_v11, %v1327_v19  ;;  %v3513_v27 = vmul.f32 %v3468_v10, %v1327_v19  ;;  %v3522_v31 = vld [vmem:[%s4524_s9 + $0x1] ss:$0 sm:$0xff]  ;;  %v3533_v37 = vld [vmem:[%s4522_s7 + $0x2] ss:$0 sm:$0xff] }
 0x14d   : > { %v1345_v21 = vld [vmem:[#allocation3 + $0x7] sm:$0xff]  ;;  %v3516_v28 = vmul.f32 %v3468_v10, %v1329_v20  ;;  %v1387_v32 = vadd.f32 %v3498_v16, %v1371_v24  ;;  %v1523_v35 = vmul.f32 %v3478_v12, %v1329_v20  ;;  %v3538_v38 = vld [vmem:[%s4522_s7 + $0x4] ss:$0 sm:$0xff]  ;;  %v3550_v42 = vmul.f32 %v3473_v11, %v1329_v20  ;;  %v3568_v54 = vld [vmem:[%s4522_s7 + $0x5] ss:$0 sm:$0xff] }
 0x14e   : > { %v1347_v22 = vld [vmem:[#allocation3 + $0x27] sm:$0xff]  ;;  %v1409_v29 = vmul.f32 %v3483_v13, %v1345_v21  ;;  %v3556_v47 = vld [vmem:[%s4524_s9 + $0x4] ss:$0 sm:$0xff]  ;;  %v3585_v62 = vld [vmem:[%s4524_s9 + $0x2] ss:$0 sm:$0xff] }
 0x14f   : > { %2889 = vmatpush3.bf16.msra.mxu1 %v2886_v9  ;;  %v1349_v23 = vld [vmem:[#allocation3 + $0x47] sm:$0xff]  ;;  %4594 = vst [vmem:[#allocation4_spill] sm:$0xff] %v3516_v28  ;;  %v3526_v33 = vmul.f32 %v3483_v13, %v1347_v22  ;;  %v1485_v34 = vmul.f32 %v3488_v14, %v1347_v22  ;;  %4596 = vst [vmem:[#allocation6_spill] sm:$0xff] %v3556_v47  ;;  %v1463_v48 = vadd.f32 %v1447_v25, %v1387_v32  ;;  %v3590_v63 = vld [vmem:[%s4524_s9 + $0x5] ss:$0 sm:$0xff] }
 0x150   : > { %v1593_v30 = vld [vmem:[#allocation2 + $0x8] sm:$0xff]  ;;  %v3543_v39 = vld [vmem:[%s4522_s7 + $0x7] ss:$0 sm:$0xff]  ;;  %v3546_v40 = vmul.f32 %v3483_v13, %v1349_v23  ;;  %v1425_v41 = vadd.f32 %v3503_v17, %v1409_v29  ;;  %v1561_v43 = vmul.f32 %v3493_v15, %v1349_v23  ;;  %v3559_v49 = vmul.f32 %v3488_v14, %v1349_v23  ;;  %4598 = vst [vmem:[#allocation8_spill] sm:$0xff] %v3590_v63  ;;  %v1862_v28 = vld [vmem:[#allocation2 + $0x11] sm:$0xff] }
 0x151   : > { %v1613_v36 = vld [vmem:[#allocation3 + $0x8] sm:$0xff]  ;;  %v1639_v52 = vmul.f32 %v3510_v26, %v1593_v30  ;;  %v3573_v55 = vld [vmem:[%s4524_s9 + $0x7] ss:$0 sm:$0xff]  ;;  %v1539_v0 = vadd.f32 %v1523_v35, %v1463_v48 }
 0x152   : > { %4595 = vst [vmem:[#allocation5_spill] sm:$0xff] %v3546_v40  ;;  %v1595_v46 = vld [vmem:[#allocation2 + $0x28] sm:$0xff]  ;;  %v1501_v56 = vadd.f32 %v1485_v34, %v1425_v41  ;;  %v1677_v59 = vmul.f32 %v3522_v31, %v1613_v36 }
 0x153   : > { %v1597_v50 = vld [vmem:[#allocation2 + $0x48] sm:$0xff]  ;;  %v3563_v53 = vmul.f32 %v3510_v26, %v1595_v46  ;;  %v1715_v2 = vmul.f32 %v3538_v38, %v1595_v46  ;;  %v1655_v18 = vadd.f32 %v1639_v52, %v1539_v0 }
 0x154   : > { %v1615_v51 = vld [vmem:[#allocation3 + $0x28] sm:$0xff]  ;;  %v3576_v58 = vmul.f32 %v3510_v26, %v1597_v50  ;;  %v3597_v3 = vmul.f32 %v3538_v38, %v1597_v50  ;;  %v1577_v44 = vadd.f32 %v1561_v43, %v1501_v56  ;;  %v1791_v6 = vmul.f32 %v3543_v39, %v1597_v50 }
 0x155   : > { %v1617_v57 = vld [vmem:[#allocation3 + $0x48] sm:$0xff]  ;;  %v3580_v60 = vmul.f32 %v3522_v31, %v1615_v51  ;;  %v1753_v45 = vmul.f32 %v3556_v47, %v1615_v51  ;;  %v1731_v41 = vadd.f32 %v1715_v2, %v1655_v18 }
 0x156   : > { %4597 = vst [vmem:[#allocation7_spill] sm:$0xff] %v3576_v58  ;;  %v1861_v61 = vld [vmem:[#allocation2 + $0x9] sm:$0xff]  ;;  %v3593_v1 = vmul.f32 %v3522_v31, %v1617_v57  ;;  %v3601_v5 = vmul.f32 %v3556_v47, %v1617_v57  ;;  %v1829_v19 = vmul.f32 %v3573_v55, %v1617_v57  ;;  %v1693_v25 = vadd.f32 %v1677_v59, %v1577_v44  ;;  %v3634_v51 = vld [vmem:[%s4522_s7 + $0x8] ss:$0 sm:$0xff] }
 0x157   : > { %v1881_v4 = vld [vmem:[#allocation3 + $0x9] sm:$0xff]  ;;  %v1907_v21 = vmul.f32 %v3533_v37, %v1861_v61  ;;  %v1807_v0 = vadd.f32 %v1791_v6, %v1731_v41 }
 0x158   : > { %4599 = vst [vmem:[#allocation9_spill] sm:$0xff] %v3593_v1  ;;  %v1863_v7 = vld [vmem:[#allocation2 + $0x29] sm:$0xff]  ;;  %v1945_v30 = vmul.f32 %v3585_v62, %v1881_v4  ;;  %v1769_v52 = vadd.f32 %v1753_v45, %v1693_v25  ;;  %v3648_v45 = vld [vmem:[%s4524_s9 + $0x8] ss:$0 sm:$0xff] }
 0x159   : > { %v1865_v8 = vld [vmem:[#allocation2 + $0x49] sm:$0xff]  ;;  %v3607_v22 = vmul.f32 %v3533_v37, %v1863_v7  ;;  %v1983_v46 = vmul.f32 %v3568_v54, %v1863_v7  ;;  %v1923_v41 = vadd.f32 %v1907_v21, %v1807_v0 }
 0x15a   : > { %v1883_v9 = vld [vmem:[#allocation3 + $0x29] sm:$0xff]  ;;  %v3610_v29 = vmul.f32 %v3533_v37, %v1865_v8  ;;  %v3627_v48 = vmul.f32 %v3568_v54, %v1865_v8 }
 0x15b   : > { %v1885_v20 = vld [vmem:[#allocation3 + $0x49] sm:$0xff]  ;;  %4600 = vst [vmem:[#allocation10_spill] sm:$0xff] %v3607_v22  ;;  %v3614_v32 = vmul.f32 %v3585_v62, %v1883_v9  ;;  %v2021_v56 = vmul.f32 %v3590_v63, %v1883_v9  ;;  %v1845_v9 = vadd.f32 %v1829_v19, %v1769_v52  ;;  %v3675_v22 = vld [vmem:[#allocation3 + $0x31] sm:$0xff] }
 0x15c   : > { %v1326_v23 = vld [vmem:[#allocation2 + $0xf] sm:$0xff]  ;;  %4601 = vst [vmem:[#allocation11_spill] sm:$0xff] %v3610_v29  ;;  %v3623_v43 = vmul.f32 %v3585_v62, %v1885_v20  ;;  %4604 = vst [vmem:[#allocation14_spill] sm:$0xff] %v3627_v48  ;;  %v2059_v29 = vmul.f32 %v3634_v51, %v1865_v8  ;;  %v2097_v21 = vmul.f32 %v3648_v45, %v1885_v20 }
 0x15d   : > { %v1346_v24 = vld [vmem:[#allocation3 + $0xf] sm:$0xff]  ;;  %4602 = vst [vmem:[#allocation12_spill] sm:$0xff] %v3614_v32  ;;  %v1372_v57 = vmul.f32 %v3468_v10, %v1326_v23  ;;  %v1999_v32 = vadd.f32 %v1983_v46, %v1923_v41  ;;  %v3687_v41 = vld [vmem:[#allocation3 + $0x67] sm:$0xff] }
 0x15e   : > { %v3616_v34 = vld [vmem:[#allocation2 + $0x2f] sm:$0xff]  ;;  %4603 = vst [vmem:[#allocation13_spill] sm:$0xff] %v3623_v43  ;;  %v1410_v59 = vmul.f32 %v3483_v13, %v1346_v24  ;;  %v3659_v43 = vmul.f32 %v3590_v63, %v1885_v20  ;;  %4608 = vst [vmem:[#allocation18_spill] sm:$0xff] %v3687_v41 }
 0x15f   : > { %v3618_v35 = vld [vmem:[#allocation2 + $0x4f] sm:$0xff]  ;;  %v1448_v2 = vmul.f32 %v3473_v11, %v3616_v34  ;;  %v1388_v18 = vadd.f32 %v3498_v16, %v1372_v57  ;;  %v1961_v57 = vadd.f32 %v1945_v30, %v1845_v9  ;;  %v1908_v9 = vmul.f32 %v3533_v37, %v1862_v28 }
 0x160   : > { %v3620_v36 = vld [vmem:[#allocation3 + $0x2f] sm:$0xff]  ;;  %v1524_v44 = vmul.f32 %v3478_v12, %v3618_v35  ;;  %v1426_v6 = vadd.f32 %v3503_v17, %v1410_v59  ;;  %4605 = vst [vmem:[#allocation15_spill] sm:$0xff] %v3659_v43 }
 0x161   : > { %v3629_v50 = vld [vmem:[#allocation3 + $0x4f] sm:$0xff]  ;;  %v1486_v4 = vmul.f32 %v3488_v14, %v3620_v36  ;;  %v1464_v59 = vadd.f32 %v1448_v2, %v1388_v18  ;;  %v2037_v20 = vadd.f32 %v2021_v56, %v1961_v57 }
 0x162   : > { %v1594_v61 = vld [vmem:[#allocation2 + $0x10] sm:$0xff]  ;;  %v1562_v23 = vmul.f32 %v3493_v15, %v3629_v50  ;;  %v3705_v57 = vld [vmem:[#allocation2 + $0x68] sm:$0xff] }
 0x163   : > { %v1614_v7 = vld [vmem:[#allocation3 + $0x10] sm:$0xff]  ;;  %v1640_v52 = vmul.f32 %v3510_v26, %v1594_v61  ;;  %v1502_v58 = vadd.f32 %v1486_v4, %v1426_v6  ;;  %v1540_v30 = vadd.f32 %v1524_v44, %v1464_v59  ;;  %v3685_v6 = vld [vmem:[#allocation2 + $0x67] sm:$0xff]  ;;  %v2022_v59 = vmul.f32 %v3590_v63, %v3675_v22 }
 0x164   : > { %v3654_v24 = vld [vmem:[#allocation2 + $0x30] sm:$0xff]  ;;  %v1678_v40 = vmul.f32 %v3522_v31, %v1614_v7  ;;  %v2075_v7 = vadd.f32 %v2059_v29, %v1999_v32  ;;  %4607 = vst [vmem:[#allocation17_spill] sm:$0xff] %v3685_v6  ;;  %v1389_v29 = vadd.f32 %v3498_v16, %v3513_v27  ;;  %v1427_v32 = vadd.f32 %v3503_v17, %v3526_v33  ;;  %v3711_v63 = vld [vmem:[#allocation3 + $0x68] sm:$0xff] }
 0x165   : > { %v3656_v25 = vld [vmem:[#allocation3 + $0x30] sm:$0xff]  ;;  %v1716_v0 = vmul.f32 %v3538_v38, %v3654_v24  ;;  %v1578_v61 = vadd.f32 %v1562_v23, %v1502_v58  ;;  %v1656_v44 = vadd.f32 %v1640_v52, %v1540_v30  ;;  %v1525_v56 = vmul.f32 %v3478_v12, %v3685_v6 }
 0x166   : > { %v3662_v1 = vld [vmem:[#allocation2 + $0x50] sm:$0xff]  ;;  %v1754_v8 = vmul.f32 %v3556_v47, %v3656_v25  ;;  %v2145_v47 = vmul.f32 0.70710677, %v2075_v7  ;;  %v1563_v52 = vmul.f32 %v3493_v15, %v3687_v41  ;;  %v3707_v30 = vadd.f32 %v2097_v21, %v2037_v20 }
 0x167   : > { %v3664_v19 = vld [vmem:[#allocation3 + $0x50] sm:$0xff]  ;;  %v1792_v2 = vmul.f32 %v3543_v39, %v3662_v1  ;;  %v1694_v58 = vadd.f32 %v1678_v40, %v1578_v61  ;;  %v1465_v61 = vadd.f32 %v3550_v42, %v1389_v29  ;;  %v1503_v27 = vadd.f32 %v3559_v49, %v1427_v32 }
 0x168   : > { %4606 = vst [vmem:[#allocation16_spill] sm:$0xff] %v3664_v19  ;;  %v1882_v48 = vld [vmem:[#allocation3 + $0x11] sm:$0xff]  ;;  %v1830_v46 = vmul.f32 %v3573_v55, %v3664_v19  ;;  %2956 = verf.f32 %v2145_v47  ;;  %v2129_v33 = vmul.f32 0.5, %v2075_v7  ;;  %v1793_v41 = vmul.f32 %v3543_v39, %v3705_v57  ;;  %v3731_v32 = vld [vmem:[#allocation2 + $0x69] sm:$0xff] }
 0x169   : > { %v3673_v43 = vld [vmem:[#allocation2 + $0x31] sm:$0xff]  ;;  %v1946_v18 = vmul.f32 %v3585_v62, %v1882_v48  ;;  %v1732_v48 = vadd.f32 %v1716_v0, %v1656_v44  ;;  %v1770_v40 = vadd.f32 %v1754_v8, %v1694_v58  ;;  %v1541_v58 = vadd.f32 %v1525_v56, %v1465_v61 }
 0x16a   : > { %v3681_v4 = vld [vmem:[#allocation2 + $0x51] sm:$0xff]  ;;  %v1984_v23 = vmul.f32 %v3568_v54, %v3673_v43  ;;  %v1579_v6 = vadd.f32 %v1563_v52, %v1503_v27  ;;  %v1374_v42 = vmul.f32 %v3468_v10, %v3616_v34  ;;  %v1831_v49 = vmul.f32 %v3573_v55, %v3711_v63 }
 0x16b   : > { %v3693_v19 = vld [vmem:[#allocation3 + $0x51] sm:$0xff]  ;;  %v2060_v28 = vmul.f32 %v3634_v51, %v3681_v4  ;;  %v1808_v0 = vadd.f32 %v1792_v2, %v1732_v48  ;;  %v1846_v8 = vadd.f32 %v1830_v46, %v1770_v40  ;;  %v1412_v2 = vmul.f32 %v3483_v13, %v3620_v36 }
 0x16c   : > { %v2098_v44 = vmul.f32 %v3648_v45, %v3693_v19  ;;  %v3717_v21 = vld [vmem:[#allocation2 + $0x6f] sm:$0xff]  ;;  %v1450_v46 = vmul.f32 %v3473_v11, %v3618_v35  ;;  %v1657_v7 = vadd.f32 %v3563_v53, %v1541_v58  ;;  %v1695_v29 = vadd.f32 %v3580_v60, %v1579_v6 }
 0x16d   : > { %4609 = vst [vmem:[#allocation19_spill] sm:$0xff] %v3717_v21  ;;  %v1924_v47 = vadd.f32 %v1908_v9, %v1808_v0  ;;  %v3723_v20 = vld [vmem:[#allocation3 + $0x6f] sm:$0xff]  ;;  %v1390_v34 = vadd.f32 %v3498_v16, %v1374_v42  ;;  %v1488_v9 = vmul.f32 %v3488_v14, %v3629_v50  ;;  %v1962_v48 = vadd.f32 %v1946_v18, %v1846_v8 }
 0x16e   : > { %4610 = vst [vmem:[#allocation20_spill] sm:$0xff] %v3723_v20  ;;  %v1428_v56 = vadd.f32 %v3503_v17, %v1412_v2  ;;  %v1526_v36 = vmul.f32 %v3478_v12, %v3717_v21  ;;  %v1733_v52 = vadd.f32 %v3597_v3, %v1657_v7  ;;  %v1771_v53 = vadd.f32 %v3601_v5, %v1695_v29  ;;  %v3747_v42 = vld [vmem:[#allocation2 + $0x70] sm:$0xff] }
 0x16f   : > { %v2000_v40 = vadd.f32 %v1984_v23, %v1924_v47  ;;  %v1466_v61 = vadd.f32 %v1450_v46, %v1390_v34  ;;  %v1564_v60 = vmul.f32 %v3493_v15, %v3723_v20  ;;  %v2061_v27 = vmul.f32 %v3634_v51, %v3731_v32  ;;  %v3751_v2 = vld [vmem:[#allocation3 + $0x69] sm:$0xff] }
 0x170   : > { %v1504_v0 = vadd.f32 %v1488_v9, %v1428_v56  ;;  %v1642_v18 = vmul.f32 %v3510_v26, %v3654_v24  ;;  %v1809_v23 = vadd.f32 %v1793_v41, %v1733_v52  ;;  %v1847_v8 = vadd.f32 %v1831_v49, %v1771_v53  ;;  %v3753_v46 = vld [vmem:[#allocation3 + $0x70] sm:$0xff]  ;;  %v4612_v49 = vld [vmem:[#allocation12_spill] sm:$0xff] }
 0x171   : > { %v2076_v6 = vadd.f32 %v2060_v28, %v2000_v40  ;;  %v1542_v58 = vadd.f32 %v1526_v36, %v1466_v61  ;;  %v1680_v3 = vmul.f32 %v3522_v31, %v3656_v25  ;;  %v2038_v5 = vadd.f32 %v2022_v59, %v1962_v48  ;;  %v4611_v24 = vld [vmem:[#allocation10_spill] sm:$0xff]  ;;  %v4613_v40 = vld [vmem:[#allocation16_spill] sm:$0xff] }
 0x172   : > { %v1580_v28 = vadd.f32 %v1564_v60, %v1504_v0  ;;  %v1718_v7 = vmul.f32 %v3538_v38, %v3662_v1  ;;  %v2957_v29 = vpop.eup %2956  ;;  %v1925_v41 = vadd.f32 %v4611_v24, %v1809_v23  ;;  %v1963_v34 = vadd.f32 %v4612_v49, %v1847_v8  ;;  %v4614_v56 = vld [vmem:[#allocation6_spill] sm:$0xff] }
 0x173   : > { %v2146_v47 = vmul.f32 0.70710677, %v2076_v6  ;;  %v1658_v9 = vadd.f32 %v1642_v18, %v1542_v58  ;;  %v1756_v36 = vmul.f32 %v4614_v56, %v4613_v40  ;;  %v2177_v25 = vadd.f32 1.0, %v2957_v29  ;;  %v4615_v52 = vld [vmem:[#allocation14_spill] sm:$0xff] }
 0x174   : > { %v1696_v59 = vadd.f32 %v1680_v3, %v1580_v28  ;;  %v1794_v48 = vmul.f32 %v3543_v39, %v3747_v42  ;;  %v2001_v53 = vadd.f32 %v4615_v52, %v1925_v41  ;;  %v2099_v61 = vmul.f32 %v3648_v45, %v3751_v2  ;;  %v3768_v8 = vld [vmem:[#allocation2 + $0x71] sm:$0xff] }
 0x175   : > { %2958 = verf.f32 %v2146_v47  ;;  %v1734_v60 = vadd.f32 %v1718_v7, %v1658_v9  ;;  %v1832_v0 = vmul.f32 %v3573_v55, %v3753_v46  ;;  %v2193_v23 = vmul.f32 %v2177_v25, %v2129_v33  ;;  %v3770_v58 = vld [vmem:[#allocation3 + $0x71] sm:$0xff] }
 0x176   : > { %v1772_v18 = vadd.f32 %v1756_v36, %v1696_v59  ;;  %4616 = vst [vmem:[#allocation10_spill] sm:$0xff] %v3770_v58  ;;  %v1910_v3 = vmul.f32 %v3533_v37, %v3673_v43  ;;  %v1948_v47 = vmul.f32 %v3585_v62, %v3675_v22  ;;  %v2114_v28 = vadd.f32 %v2098_v44, %v2038_v5  ;;  %v4617_v33 = vld [vmem:[#allocation15_spill] sm:$0xff]  ;;  %v4618_v36 = vld [vmem:[#allocation8_spill] sm:$0xff] }
 0x177   : > { %v2077_v29 = vadd.f32 %v2061_v27, %v2001_v53  ;;  %v1810_v24 = vadd.f32 %v1794_v48, %v1734_v60  ;;  %v1986_v7 = vmul.f32 %v3568_v54, %v3681_v4  ;;  %v2209_v41 = vmul.f32 %v2193_v23, %v3707_v30  ;;  %v3782_v59 = vld [vmem:[#allocation2 + $0x87] sm:$0xff] }
 0x178   : > { %v2039_v49 = vadd.f32 %v4617_v33, %v1963_v34  ;;  %v1848_v9 = vadd.f32 %v1832_v0, %v1772_v18  ;;  %v2024_v25 = vmul.f32 %v4618_v36, %v3693_v19  ;;  %4619 = vst [vmem:[#allocation12_spill] sm:$0xff] %v3782_v59  ;;  %v2062_v22 = vmul.f32 %v3634_v51, %v3768_v8  ;;  %v3788_v27 = vld [vmem:[#allocation3 + $0x87] sm:$0xff]  ;;  %v4623_v18 = vld [vmem:[#allocation18_spill] sm:$0xff] }
 0x179   : > { %v2147_v43 = vmul.f32 0.70710677, %v2077_v29  ;;  %v1926_v52 = vadd.f32 %v1910_v3, %v1810_v24  ;;  %v2100_v44 = vmul.f32 %v3648_v45, %v3770_v58  ;;  %2858 = vmatprep.mubr.msk.f32.mxu1 %vm1193_vm3, %v2209_v41  ;;  %v4620_v5 = vld [vmem:[#allocation4_spill] sm:$0xff]  ;;  %v4621_v48 = vld [vmem:[#allocation5_spill] sm:$0xff]  ;;  %v1489_v3 = vmul.f32 %v3488_v14, %v4623_v18 }
 0x17a   : > { %v1964_v30 = vadd.f32 %v1948_v47, %v1848_v9  ;;  %v1391_v34 = vadd.f32 %v3498_v16, %v4620_v5  ;;  %v1429_v53 = vadd.f32 %v3503_v17, %v4621_v48  ;;  %v4622_v60 = vld [vmem:[#allocation17_spill] sm:$0xff]  ;;  %v1527_v24 = vmul.f32 %v3478_v12, %v3782_v59 }
 0x17b   : > { %v1451_v0 = vmul.f32 %v3473_v11, %v4622_v60  ;;  %2960 = verf.f32 %v2147_v43  ;;  %v2002_v23 = vadd.f32 %v1986_v7, %v1926_v52  ;;  %v3801_v33 = vld [vmem:[#allocation2 + $0x88] sm:$0xff]  ;;  %v2130_v47 = vmul.f32 0.5, %v2076_v6 }
 0x17c   : > { %v2040_v41 = vadd.f32 %v2024_v25, %v1964_v30  ;;  %v1565_v5 = vmul.f32 %v3493_v15, %v3788_v27  ;;  %v3805_v48 = vadd.f32 %v2099_v61, %v2039_v49  ;;  %v2131_v58 = vmul.f32 0.5, %v2077_v29  ;;  %v3807_v7 = vld [vmem:[#allocation3 + $0x88] sm:$0xff] }
 0x17d   : > { %v1467_v9 = vadd.f32 %v1451_v0, %v1391_v34  ;;  %v2078_v60 = vadd.f32 %v2062_v22, %v2002_v23  ;;  %v1505_v43 = vadd.f32 %v1489_v3, %v1429_v53  ;;  %4624 = vst [vmem:[#allocation16_spill] sm:$0xff] %v3807_v7  ;;  %v1719_v59 = vmul.f32 %v3538_v38, %v3705_v57  ;;  %v4625_v22 = vld [vmem:[#allocation7_spill] sm:$0xff]  ;;  %v3824_v3 = vld [vmem:[#allocation2 + $0x8f] sm:$0xff] }
 0x17e   : > { %v1757_v6 = vmul.f32 %v4614_v56, %v3711_v63  ;;  %v1795_v25 = vmul.f32 %v3543_v39, %v3801_v33  ;;  %v3815_v34 = vadd.f32 %v2100_v44, %v2040_v41  ;;  %v1833_v0 = vmul.f32 %v3573_v55, %v3807_v7  ;;  %4626 = vst [vmem:[#allocation6_spill] sm:$0xff] %v3824_v3  ;;  %v3827_v44 = vld [vmem:[#allocation3 + $0x8f] sm:$0xff] }
 0x17f   : > { %v2959_v52 = vpop.eup %2958  ;;  %v1543_v18 = vadd.f32 %v1527_v24, %v1467_v9  ;;  %v2148_v61 = vmul.f32 0.70710677, %v2078_v60  ;;  %v1581_v29 = vadd.f32 %v1565_v5, %v1505_v43  ;;  %v3817_v49 = vmul.f32 0.5, %v2078_v60  ;;  %v4627_v9 = vld [vmem:[#allocation9_spill] sm:$0xff]  ;;  %4628 = vst [vmem:[#allocation14_spill] sm:$0xff] %v3827_v44 }
 0x180   : > { %v2178_v30 = vadd.f32 1.0, %v2959_v52  ;;  %v1987_v23 = vmul.f32 %v3568_v54, %v3731_v32  ;;  %v1376_v60 = vmul.f32 %v3468_v10, %v3618_v35  ;;  %v3831_v5 = vld [vmem:[#allocation2 + $0x89] sm:$0xff]  ;;  %v1452_v43 = vmul.f32 %v3473_v11, %v3717_v21 }
 0x181   : > { %v1659_v53 = vadd.f32 %v4625_v22, %v1543_v18  ;;  %2962 = verf.f32 %v2148_v61  ;;  %v1697_v52 = vadd.f32 %v4627_v9, %v1581_v29  ;;  %4629 = vst [vmem:[#allocation15_spill] sm:$0xff] %v3831_v5  ;;  %v1414_v18 = vmul.f32 %v3483_v13, %v3629_v50 }
 0x182   : > { %v2194_v24 = vmul.f32 %v2178_v30, %v2130_v47  ;;  %v1490_v47 = vmul.f32 %v3488_v14, %v3723_v20  ;;  %v1392_v29 = vadd.f32 %v3498_v16, %v1376_v60  ;;  %v1528_v22 = vmul.f32 %v3478_v12, %v3824_v3  ;;  %v4631_v60 = vld [vmem:[#allocation11_spill] sm:$0xff]  ;;  %v3855_v20 = vld [vmem:[#allocation2 + $0x90] sm:$0xff] }
 0x183   : > { %v1735_v41 = vadd.f32 %v1719_v59, %v1659_v53  ;;  %v1773_v61 = vadd.f32 %v1757_v6, %v1697_v52  ;;  %v3842_v59 = vld [vmem:[#allocation3 + $0x89] sm:$0xff]  ;;  %v2025_v53 = vmul.f32 %v4618_v36, %v3751_v2  ;;  %v1430_v50 = vadd.f32 %v3503_v17, %v1414_v18  ;;  %4632 = vst [vmem:[#allocation4_spill] sm:$0xff] %v3855_v20 }
 0x184   : > { %v2210_v30 = vmul.f32 %v2194_v24, %v2114_v28  ;;  %4630 = vst [vmem:[#allocation8_spill] sm:$0xff] %v3842_v59  ;;  %v1566_v9 = vmul.f32 %v3493_v15, %v3827_v44  ;;  %v2063_v6 = vmul.f32 %v3634_v51, %v3831_v5  ;;  %v1468_v24 = vadd.f32 %v1452_v43, %v1392_v29  ;;  %v3857_v18 = vld [vmem:[#allocation3 + $0x90] sm:$0xff] }
 0x185   : > { %v1811_v35 = vadd.f32 %v1795_v25, %v1735_v41  ;;  %v2961_v21 = vpop.eup %2960  ;;  %v1849_v28 = vadd.f32 %v1833_v0, %v1773_v61  ;;  %v1644_v25 = vmul.f32 %v3510_v26, %v3662_v1  ;;  %v1506_v3 = vadd.f32 %v1490_v47, %v1430_v50  ;;  %4633 = vst [vmem:[#allocation5_spill] sm:$0xff] %v3857_v18 }
 0x186   : > { %2859 = vmatmul.mubr.msk.f32.vlgmr.msra.gmra.mrb[22].mxu1 %vm1193_vm3, %v2210_v30  ;;  %v2179_v52 = vadd.f32 1.0, %v2961_v21  ;;  %v1682_v44 = vmul.f32 %v3522_v31, %v4613_v40  ;;  %v4634_v30 = vld [vmem:[#allocation13_spill] sm:$0xff]  ;;  %v2101_v61 = vmul.f32 %v3648_v45, %v3842_v59  ;;  %v1544_v43 = vadd.f32 %v1528_v22, %v1468_v24 }
 0x187   : > { %v1927_v41 = vadd.f32 %v4631_v60, %v1811_v35  ;;  %v1965_v0 = vadd.f32 %v4634_v30, %v1849_v28  ;;  %v1720_v1 = vmul.f32 %v3538_v38, %v3747_v42  ;;  %v1582_v35 = vadd.f32 %v1566_v9, %v1506_v3  ;;  %v3872_v28 = vld [vmem:[#allocation2 + $0x91] sm:$0xff] }
 0x188   : > { %v2195_v21 = vmul.f32 %v2179_v52, %v2131_v58  ;;  %v1758_v47 = vmul.f32 %v4614_v56, %v3753_v46  ;;  %v1660_v50 = vadd.f32 %v1644_v25, %v1544_v43  ;;  %v1796_v60 = vmul.f32 %v3543_v39, %v3855_v20  ;;  %v4635_v30 = vld [vmem:[#allocation10_spill] sm:$0xff] }
 0x189   : > { %v2003_v29 = vadd.f32 %v1987_v23, %v1927_v41  ;;  %v1834_v40 = vmul.f32 %v3573_v55, %v3857_v18  ;;  %v1912_v22 = vmul.f32 %v3533_v37, %v3681_v4  ;;  %v2041_v58 = vadd.f32 %v2025_v53, %v1965_v0 }
 0x18a   : > { %v2211_v24 = vmul.f32 %v2195_v21, %v3805_v48  ;;  %v1698_v3 = vadd.f32 %v1682_v44, %v1582_v35  ;;  %v1736_v52 = vadd.f32 %v1720_v1, %v1660_v50  ;;  %v1950_v25 = vmul.f32 %v3585_v62, %v3693_v19  ;;  %v3886_v44 = vld [vmem:[#allocation2 + $0xa7] sm:$0xff]  ;;  %v4637_v1 = vld [vmem:[#allocation18_spill] sm:$0xff] }
 0x18b   : > { %v2079_v23 = vadd.f32 %v2063_v6, %v2003_v29  ;;  %v2963_v9 = vpop.eup %2962  ;;  %v1988_v41 = vmul.f32 %v3568_v54, %v3768_v8  ;;  %v2026_v43 = vmul.f32 %v4618_v36, %v4635_v30  ;;  %v2064_v48 = vmul.f32 %v3634_v51, %v3872_v28  ;;  %v3888_v6 = vld [vmem:[#allocation3 + $0xa7] sm:$0xff] }
 0x18c   : > { %2861 = vmatprep.mubr.msk.f32.mxu1 %vm1193_vm3, %v2211_v24  ;;  %v2180_v18 = vadd.f32 1.0, %v2963_v9  ;;  %v1774_v20 = vadd.f32 %v1758_v47, %v1698_v3  ;;  %v1812_v53 = vadd.f32 %v1796_v60, %v1736_v52  ;;  %v4636_v19 = vld [vmem:[#allocation17_spill] sm:$0xff]  ;;  %v1415_v21 = vmul.f32 %v3483_v13, %v4637_v1  ;;  %v4638_v29 = vld [vmem:[#allocation12_spill] sm:$0xff]  ;;  %v3899_v3 = vld [vmem:[#allocation3 + $0x91] sm:$0xff] }
 0x18d   : > { %v2149_v4 = vmul.f32 0.70710677, %v2079_v23  ;;  %v1377_v0 = vmul.f32 %v3468_v10, %v4636_v19  ;;  %v1453_v35 = vmul.f32 %v3473_v11, %v4638_v29  ;;  %v1491_v24 = vmul.f32 %v3488_v14, %v3788_v27 }
 0x18e   : > { %v2196_v50 = vmul.f32 %v2180_v18, %v3817_v49  ;;  %v1850_v47 = vadd.f32 %v1834_v40, %v1774_v20  ;;  %v1928_v60 = vadd.f32 %v1912_v22, %v1812_v53  ;;  %v1431_v52 = vadd.f32 %v3503_v17, %v1415_v21  ;;  %v3910_v22 = vld [vmem:[#allocation2 + $0xa8] sm:$0xff] }
 0x18f   : > { %2964 = verf.f32 %v2149_v4  ;;  %v1393_v9 = vadd.f32 %v3498_v16, %v1377_v0  ;;  %v1529_v19 = vmul.f32 %v3478_v12, %v3886_v44  ;;  %v1567_v49 = vmul.f32 %v3493_v15, %v3888_v6  ;;  %4639 = vst [vmem:[#allocation7_spill] sm:$0xff] %v3910_v22  ;;  %v3912_v53 = vld [vmem:[#allocation3 + $0xa8] sm:$0xff] }
 0x190   : > { %v2212_v1 = vmul.f32 %v2196_v50, %v3815_v34  ;;  %v1966_v29 = vadd.f32 %v1950_v25, %v1850_v47  ;;  %v1645_v20 = vmul.f32 %v3510_v26, %v3705_v57  ;;  %v2004_v18 = vadd.f32 %v1988_v41, %v1928_v60  ;;  %4640 = vst [vmem:[#allocation9_spill] sm:$0xff] %v3912_v53 }
 0x191   : > { %v1469_v40 = vadd.f32 %v1453_v35, %v1393_v9  ;;  %v1507_v4 = vadd.f32 %v1491_v24, %v1431_v52  ;;  %v1683_v0 = vmul.f32 %v3522_v31, %v3711_v63  ;;  %v2117_v34 = vadd.f32 %v2101_v61, %v2041_v58  ;;  %v3923_v24 = vld [vmem:[#allocation2 + $0xa9] sm:$0xff] }
 0x192   : > { %2862 = vmatmul.mubr.msk.f32.gmra.mrb[24].mxu1 %vm1193_vm3, %v2212_v1  ;;  %v2133_v25 = vmul.f32 0.5, %v2079_v23  ;;  %v2102_v21 = vmul.f32 %v3648_v45, %v3899_v3  ;;  %v1721_v57 = vmul.f32 %v3538_v38, %v3801_v33  ;;  %v2080_v41 = vadd.f32 %v2064_v48, %v2004_v18  ;;  %4641 = vst [vmem:[#allocation11_spill] sm:$0xff] %v3923_v24 }
 0x193   : > { %v1545_v35 = vadd.f32 %v1529_v19, %v1469_v40  ;;  %v1583_v50 = vadd.f32 %v1567_v49, %v1507_v4  ;;  %v1759_v47 = vmul.f32 %v4614_v56, %v3807_v7  ;;  %v2042_v60 = vadd.f32 %v2026_v43, %v1966_v29  ;;  %v3933_v19 = vld [vmem:[#allocation2 + $0xaf] sm:$0xff]  ;;  %v4643_v49 = vld [vmem:[#allocation19_spill] sm:$0xff] }
 0x194   : > { %v1797_v63 = vmul.f32 %v3543_v39, %v3910_v22  ;;  %v1835_v61 = vmul.f32 %v3573_v55, %v3912_v53  ;;  %v1913_v58 = vmul.f32 %v3533_v37, %v3731_v32  ;;  %v2150_v23 = vmul.f32 0.70710677, %v2080_v41  ;;  %4642 = vst [vmem:[#allocation13_spill] sm:$0xff] %v3933_v19  ;;  %v3943_v40 = vld [vmem:[#allocation3 + $0xaf] sm:$0xff] }
 0x195   : > { %v1661_v9 = vadd.f32 %v1645_v20, %v1545_v35  ;;  %v1699_v48 = vadd.f32 %v1683_v0, %v1583_v50  ;;  %v1951_v52 = vmul.f32 %v3585_v62, %v3751_v2  ;;  %v1989_v43 = vmul.f32 %v3568_v54, %v3831_v5  ;;  %4644 = vst [vmem:[#allocation10_spill] sm:$0xff] %v3943_v40  ;;  %v4645_v2 = vld [vmem:[#allocation20_spill] sm:$0xff]  ;;  %v4646_v50 = vld [vmem:[#allocation6_spill] sm:$0xff] }
 0x196   : > { %v2027_v29 = vmul.f32 %v4618_v36, %v3842_v59  ;;  %v2065_v1 = vmul.f32 %v3634_v51, %v3923_v24  ;;  %v1378_v32 = vmul.f32 %v3468_v10, %v4643_v49  ;;  %2966 = verf.f32 %v2150_v23  ;;  %v4647_v5 = vld [vmem:[#allocation14_spill] sm:$0xff] }
 0x197   : > { %v1737_v20 = vadd.f32 %v1721_v57, %v1661_v9  ;;  %v1775_v18 = vadd.f32 %v1759_v47, %v1699_v48  ;;  %v1416_v4 = vmul.f32 %v3483_v13, %v4645_v2  ;;  %v1454_v59 = vmul.f32 %v3473_v11, %v4646_v50 }
 0x198   : > { %v1394_v35 = vadd.f32 %v3498_v16, %v1378_v32  ;;  %v1492_v24 = vmul.f32 %v3488_v14, %v4647_v5  ;;  %v1530_v49 = vmul.f32 %v3478_v12, %v3933_v19  ;;  %v1568_v2 = vmul.f32 %v3493_v15, %v3943_v40  ;;  %v3961_v5 = vld [vmem:[#allocation3 + $0xa9] sm:$0xff] }
 0x199   : > { %v2965_v0 = vpop.eup %2964  ;;  %v1813_v57 = vadd.f32 %v1797_v63, %v1737_v20  ;;  %v1851_v47 = vadd.f32 %v1835_v61, %v1775_v18  ;;  %v1432_v9 = vadd.f32 %v3503_v17, %v1416_v4  ;;  %v1646_v32 = vmul.f32 %v3510_v26, %v3747_v42  ;;  %4648 = vst [vmem:[#allocation17_spill] sm:$0xff] %v3961_v5  ;;  %v3963_v63 = vld [vmem:[#allocation2 + $0xb0] sm:$0xff]  ;;  %v4649_v4 = vld [vmem:[#allocation4_spill] sm:$0xff] }
 0x19a   : > { %v2181_v23 = vadd.f32 1.0, %v2965_v0  ;;  %v1470_v48 = vadd.f32 %v1454_v59, %v1394_v35  ;;  %v1684_v50 = vmul.f32 %v3522_v31, %v3753_v46  ;;  %v2118_v61 = vadd.f32 %v2102_v21, %v2042_v60  ;;  %v3965_v18 = vld [vmem:[#allocation3 + $0xb0] sm:$0xff]  ;;  %v4650_v46 = vld [vmem:[#allocation5_spill] sm:$0xff] }
 0x19b   : > { %v1929_v22 = vadd.f32 %v1913_v58, %v1813_v57  ;;  %v1967_v19 = vadd.f32 %v1951_v52, %v1851_v47  ;;  %v1508_v0 = vadd.f32 %v1492_v24, %v1432_v9  ;;  %v2134_v20 = vmul.f32 0.5, %v2080_v41  ;;  %v3975_v41 = vld [vmem:[#allocation2 + $0xb1] sm:$0xff] }
 0x19c   : > { %v2197_v53 = vmul.f32 %v2181_v23, %v2133_v25  ;;  %v1546_v59 = vadd.f32 %v1530_v49, %v1470_v48  ;;  %v1722_v35 = vmul.f32 %v3538_v38, %v4649_v4  ;;  %v1760_v25 = vmul.f32 %v4614_v56, %v4650_v46 }
 0x19d   : > { %v2005_v40 = vadd.f32 %v1989_v43, %v1929_v22  ;;  %v1584_v7 = vadd.f32 %v1568_v2, %v1508_v0  ;;  %v2043_v23 = vadd.f32 %v2027_v29, %v1967_v19  ;;  %v2103_v24 = vmul.f32 %v3648_v45, %v3961_v5 }
 0x19e   : > { %v2213_v42 = vmul.f32 %v2197_v53, %v2117_v34  ;;  %v1662_v58 = vadd.f32 %v1646_v32, %v1546_v59  ;;  %v1798_v21 = vmul.f32 %v3543_v39, %v3963_v63  ;;  %v1836_v22 = vmul.f32 %v3573_v55, %v3965_v18 }
 0x19f   : > { %v2081_v60 = vadd.f32 %v2065_v1, %v2005_v40  ;;  %v1700_v52 = vadd.f32 %v1684_v50, %v1584_v7  ;;  %v1914_v53 = vmul.f32 %v3533_v37, %v3768_v8  ;;  %v1952_v19 = vmul.f32 %v3585_v62, %v4635_v30  ;;  %v3990_v40 = vld [vmem:[#allocation2 + $0xc7] sm:$0xff] }
 0x1a0   : > { %2864 = vmatprep.mubr.msk.f32.mxu1 %vm1193_vm3, %v2213_v42  ;;  %v1738_v34 = vadd.f32 %v1722_v35, %v1662_v58  ;;  %v1990_v43 = vmul.f32 %v3568_v54, %v3872_v28  ;;  %v2028_v29 = vmul.f32 %v4618_v36, %v3899_v3  ;;  %v2967_v49 = vpop.eup %2966  ;;  %v2066_v7 = vmul.f32 %v3634_v51, %v3975_v41  ;;  %v4651_v50 = vld [vmem:[#allocation12_spill] sm:$0xff]  ;;  %v4003_v42 = vld [vmem:[#allocation3 + $0xb1] sm:$0xff] }
 0x1a1   : > { %v2151_v57 = vmul.f32 0.70710677, %v2081_v60  ;;  %v1776_v1 = vadd.f32 %v1760_v25, %v1700_v52  ;;  %v1379_v8 = vmul.f32 %v3468_v10, %v4651_v50  ;;  %v2182_v47 = vadd.f32 1.0, %v2967_v49  ;;  %v3994_v30 = vld [vmem:[#allocation3 + $0xc7] sm:$0xff] }
 0x1a2   : > { %v1814_v9 = vadd.f32 %v1798_v21, %v1738_v34  ;;  %v1417_v48 = vmul.f32 %v3483_v13, %v3788_v27  ;;  %v1455_v2 = vmul.f32 %v3473_v11, %v3886_v44  ;;  %v1493_v59 = vmul.f32 %v3488_v14, %v3888_v6  ;;  %v4014_v50 = vld [vmem:[#allocation3 + $0xc8] sm:$0xff] }
 0x1a3   : > { %2968 = verf.f32 %v2151_v57  ;;  %v1852_v32 = vadd.f32 %v1836_v22, %v1776_v1  ;;  %v1395_v0 = vadd.f32 %v3498_v16, %v1379_v8  ;;  %v2198_v35 = vmul.f32 %v2182_v47, %v2134_v20  ;;  %v4012_v20 = vld [vmem:[#allocation2 + $0xc8] sm:$0xff]  ;;  %4653 = vst [vmem:[#allocation19_spill] sm:$0xff] %v4014_v50 }
 0x1a4   : > { %v1930_v25 = vadd.f32 %v1914_v53, %v1814_v9  ;;  %v1433_v58 = vadd.f32 %v3503_v17, %v1417_v48  ;;  %v1531_v21 = vmul.f32 %v3478_v12, %v3990_v40  ;;  %v1569_v34 = vmul.f32 %v3493_v15, %v3994_v30  ;;  %4652 = vst [vmem:[#allocation18_spill] sm:$0xff] %v4012_v20  ;;  %v4654_v53 = vld [vmem:[#allocation16_spill] sm:$0xff]  ;;  %v4655_v48 = vld [vmem:[#allocation7_spill] sm:$0xff] }
 0x1a5   : > { %v1968_v27 = vadd.f32 %v1952_v19, %v1852_v32  ;;  %v1471_v52 = vadd.f32 %v1455_v2, %v1395_v0  ;;  %v1647_v22 = vmul.f32 %v3510_v26, %v3801_v33  ;;  %v2214_v49 = vmul.f32 %v2198_v35, %v2118_v61  ;;  %v4656_v32 = vld [vmem:[#allocation9_spill] sm:$0xff] }
 0x1a6   : > { %v2006_v57 = vadd.f32 %v1990_v43, %v1930_v25  ;;  %v1509_v1 = vadd.f32 %v1493_v59, %v1433_v58  ;;  %v1685_v8 = vmul.f32 %v3522_v31, %v4654_v53  ;;  %v2119_v47 = vadd.f32 %v2103_v24, %v2043_v23  ;;  %v4025_v59 = vld [vmem:[#allocation2 + $0xc9] sm:$0xff] }
 0x1a7   : > { %v2104_v19 = vmul.f32 %v3648_v45, %v4003_v42  ;;  %v1547_v9 = vadd.f32 %v1531_v21, %v1471_v52  ;;  %v1723_v2 = vmul.f32 %v3538_v38, %v4655_v48  ;;  %2865 = vmatmul.mubr.msk.f32.gmra.mrb[26].mxu1 %vm1193_vm3, %v2214_v49  ;;  %v2135_v33 = vmul.f32 0.5, %v2081_v60  ;;  %4657 = vst [vmem:[#allocation20_spill] sm:$0xff] %v4025_v59  ;;  %v4658_v52 = vld [vmem:[#allocation15_spill] sm:$0xff]  ;;  %v4035_v49 = vld [vmem:[#allocation2 + $0xcf] sm:$0xff] }
 0x1a8   : > { %v2082_v61 = vadd.f32 %v2066_v7, %v2006_v57  ;;  %v1585_v43 = vadd.f32 %v1569_v34, %v1509_v1  ;;  %v1761_v0 = vmul.f32 %v4614_v56, %v4656_v32  ;;  %v2044_v35 = vadd.f32 %v2028_v29, %v1968_v27  ;;  %v4659_v7 = vld [vmem:[#allocation8_spill] sm:$0xff]  ;;  %v4660_v1 = vld [vmem:[#allocation11_spill] sm:$0xff] }
 0x1a9   : > { %v1663_v25 = vadd.f32 %v1647_v22, %v1547_v9  ;;  %v1799_v23 = vmul.f32 %v3543_v39, %v4012_v20  ;;  %v1837_v24 = vmul.f32 %v3573_v55, %v4014_v50  ;;  %v1915_v60 = vmul.f32 %v3533_v37, %v4658_v52  ;;  %v4661_v9 = vld [vmem:[#allocation6_spill] sm:$0xff]  ;;  %v4663_v50 = vld [vmem:[#allocation13_spill] sm:$0xff] }
 0x1aa   : > { %v2152_v58 = vmul.f32 0.70710677, %v2082_v61  ;;  %v1701_v21 = vadd.f32 %v1685_v8, %v1585_v43  ;;  %v1953_v34 = vmul.f32 %v3585_v62, %v4659_v7  ;;  %v1991_v29 = vmul.f32 %v3568_v54, %v4660_v1  ;;  %v4043_v8 = vld [vmem:[#allocation3 + $0xcf] sm:$0xff] }
 0x1ab   : > { %v1739_v57 = vadd.f32 %v1723_v2, %v1663_v25  ;;  %v2029_v27 = vmul.f32 %v4618_v36, %v3961_v5  ;;  %v2067_v22 = vmul.f32 %v3634_v51, %v4025_v59  ;;  %v1380_v43 = vmul.f32 %v3468_v10, %v4661_v9  ;;  %v4662_v52 = vld [vmem:[#allocation14_spill] sm:$0xff] }
 0x1ac   : > { %2970 = verf.f32 %v2152_v58  ;;  %v1777_v53 = vadd.f32 %v1761_v0, %v1701_v21  ;;  %v1418_v7 = vmul.f32 %v3483_v13, %v4662_v52  ;;  %v1456_v1 = vmul.f32 %v3473_v11, %v4663_v50  ;;  %v4664_v20 = vld [vmem:[#allocation10_spill] sm:$0xff] }
 0x1ad   : > { %v2969_v2 = vpop.eup %2968  ;;  %v1815_v25 = vadd.f32 %v1799_v23, %v1739_v57  ;;  %v1494_v5 = vmul.f32 %v3488_v14, %v4664_v20  ;;  %v1532_v58 = vmul.f32 %v3478_v12, %v4035_v49  ;;  %v1396_v59 = vadd.f32 %v3498_v16, %v1380_v43  ;;  %v4063_v57 = vld [vmem:[#allocation3 + $0xc9] sm:$0xff] }
 0x1ae   : > { %v2183_v0 = vadd.f32 1.0, %v2969_v2  ;;  %v1853_v21 = vadd.f32 %v1837_v24, %v1777_v53  ;;  %v1434_v10 = vadd.f32 %v3503_v17, %v1418_v7  ;;  %v1570_v13 = vmul.f32 %v3493_v15, %v4043_v8  ;;  %v4065_v53 = vld [vmem:[#allocation2 + $0xd0] sm:$0xff]  ;;  %v4088_v2 = vld [vmem:[#allocation2 + $0xe7] sm:$0xff] }
 0x1af   : > { %v1931_v9 = vadd.f32 %v1915_v60, %v1815_v25  ;;  %v1648_v23 = vmul.f32 %v3510_v26, %v4649_v4  ;;  %v1686_v11 = vmul.f32 %v3522_v31, %v4650_v46  ;;  %v1472_v52 = vadd.f32 %v1456_v1, %v1396_v59  ;;  %v4067_v60 = vld [vmem:[#allocation3 + $0xd0] sm:$0xff]  ;;  %v4090_v25 = vld [vmem:[#allocation3 + $0xe7] sm:$0xff] }
 0x1b0   : > { %v2199_v14 = vmul.f32 %v2183_v0, %v2135_v33  ;;  %v1969_v12 = vadd.f32 %v1953_v34, %v1853_v21  ;;  %v1510_v24 = vadd.f32 %v1494_v5, %v1434_v10  ;;  %v2120_v16 = vadd.f32 %v2104_v19, %v2044_v35  ;;  %4665 = vst [vmem:[#allocation4_spill] sm:$0xff] %v4090_v25  ;;  %v4111_v0 = vld [vmem:[%s4522_s7 + $0x3] ss:$0 sm:$0xff] }
 0x1b1   : > { %v2007_v17 = vadd.f32 %v1991_v29, %v1931_v9  ;;  %v1724_v15 = vmul.f32 %v3538_v38, %v3963_v63  ;;  %v1548_v26 = vadd.f32 %v1532_v58, %v1472_v52  ;;  %v1762_v31 = vmul.f32 %v4614_v56, %v3965_v18  ;;  %v4118_v9 = vld [vmem:[%s4523_s8] ss:$0 sm:$0xff]  ;;  %v4137_v52 = vld [vmem:[%s4522_s7 + $0x6] ss:$0 sm:$0xff] }
 0x1b2   : > { %v2215_v43 = vmul.f32 %v2199_v14, %v2119_v47  ;;  %v1586_v4 = vadd.f32 %v1570_v13, %v1510_v24  ;;  %v2136_v46 = vmul.f32 0.5, %v2082_v61  ;;  %v2105_v5 = vmul.f32 %v3648_v45, %v4063_v57  ;;  %v4131_v14 = vld [vmem:[%s4525_s10] ss:$0 sm:$0xff] }
 0x1b3   : > { %v2083_v33 = vadd.f32 %v2067_v22, %v2007_v17  ;;  %v1800_v19 = vmul.f32 %v3543_v39, %v4065_v53  ;;  %v2045_v59 = vadd.f32 %v2029_v27, %v1969_v12  ;;  %v1664_v35 = vadd.f32 %v1648_v23, %v1548_v26  ;;  %v4144_v17 = vld [vmem:[%s4524_s9 + $0x6] ss:$0 sm:$0xff] }
 0x1b4   : > { %2867 = vmatprep.mubr.msk.f32.mxu1 %vm1193_vm3, %v2215_v43  ;;  %v1702_v34 = vadd.f32 %v1686_v11, %v1586_v4  ;;  %v1838_v38 = vmul.f32 %v3573_v55, %v4067_v60  ;;  %v1916_v1 = vmul.f32 %v3533_v37, %v3872_v28  ;;  %v1954_v61 = vmul.f32 %v3585_v62, %v3899_v3  ;;  %v4095_v37 = vld [vmem:[%s4522_s7] ss:$0 sm:$0xff] }
 0x1b5   : > { %v2153_v47 = vmul.f32 0.70710677, %v2083_v33  ;;  %v1992_v29 = vmul.f32 %v3568_v54, %v3975_v41  ;;  %v1740_v39 = vadd.f32 %v1724_v15, %v1664_v35  ;;  %v2030_v27 = vmul.f32 %v4618_v36, %v4003_v42  ;;  %v4099_v54 = vld [vmem:[#allocation2 + $0xd1] sm:$0xff]  ;;  %v4104_v36 = vld [vmem:[%s4524_s9] ss:$0 sm:$0xff] }
 0x1b6   : > { %v2971_v22 = vpop.eup %2970  ;;  %v1778_v7 = vadd.f32 %v1762_v31, %v1702_v34  ;;  %v1381_v28 = vmul.f32 %v4095_v37, %v3886_v44  ;;  %v1419_v58 = vmul.f32 %v4104_v36, %v3888_v6  ;;  %v1457_v44 = vmul.f32 %v4111_v0, %v3990_v40  ;;  %v4124_v6 = vld [vmem:[%s4524_s9 + $0x3] ss:$0 sm:$0xff]  ;;  %v4153_v31 = vld [vmem:[%s4522_s7 + $0x1] ss:$0 sm:$0xff]  ;;  %v4157_v35 = vld [vmem:[#allocation3 + $0xd1] sm:$0xff] }
 0x1b7   : > { %v2184_v3 = vadd.f32 1.0, %v2971_v22  ;;  %2972 = verf.f32 %v2153_v47  ;;  %v1816_v21 = vadd.f32 %v1800_v19, %v1740_v39  ;;  %v1495_v23 = vmul.f32 %v4124_v6, %v3994_v30  ;;  %4666 = vst [vmem:[#allocation5_spill] sm:$0xff] %v4157_v35  ;;  %v4159_v47 = vld [vmem:[#allocation2 + $0xe8] sm:$0xff] }
 0x1b8   : > { %v1854_v10 = vadd.f32 %v1838_v38, %v1778_v7  ;;  %v1397_v13 = vadd.f32 %v4118_v9, %v1381_v28  ;;  %v1435_v12 = vadd.f32 %v4131_v14, %v1419_v58  ;;  %v1533_v24 = vmul.f32 %v4137_v52, %v4088_v2  ;;  %v4168_v28 = vld [vmem:[#allocation3 + $0xe8] sm:$0xff] }
 0x1b9   : > { %v2200_v11 = vmul.f32 %v2184_v3, %v2136_v46  ;;  %v1571_v15 = vmul.f32 %v4144_v17, %v4090_v25  ;;  %v1932_v43 = vadd.f32 %v1916_v1, %v1816_v21  ;;  %v2068_v26 = vmul.f32 %v3634_v51, %v4099_v54  ;;  %v4164_v1 = vld [vmem:[%s4524_s9 + $0x1] ss:$0 sm:$0xff]  ;;  %v4668_v21 = vld [vmem:[#allocation19_spill] sm:$0xff] }
 0x1ba   : > { %v1473_v4 = vadd.f32 %v1457_v44, %v1397_v13  ;;  %v1649_v46 = vmul.f32 %v4153_v31, %v4655_v48  ;;  %v1970_v34 = vadd.f32 %v1954_v61, %v1854_v10  ;;  %v1511_v38 = vadd.f32 %v1495_v23, %v1435_v12  ;;  %v4173_v48 = vld [vmem:[%s4522_s7 + $0x4] ss:$0 sm:$0xff]  ;;  %v4185_v23 = vld [vmem:[%s4522_s7 + $0x7] ss:$0 sm:$0xff] }
 0x1bb   : > { %v2216_v19 = vmul.f32 %v2200_v11, %v2120_v16  ;;  %v1687_v22 = vmul.f32 %v4164_v1, %v4656_v32  ;;  %v2008_v39 = vadd.f32 %v1992_v29, %v1932_v43  ;;  %v4667_v16 = vld [vmem:[#allocation18_spill] sm:$0xff]  ;;  %v2121_v3 = vadd.f32 %v2105_v5, %v2045_v59  ;;  %v4669_v59 = vld [vmem:[#allocation11_spill] sm:$0xff] }
 0x1bc   : > { %v1549_v7 = vadd.f32 %v1533_v24, %v1473_v4  ;;  %v1725_v61 = vmul.f32 %v4173_v48, %v4667_v16  ;;  %v2137_v58 = vmul.f32 0.5, %v2083_v33  ;;  %v1587_v44 = vadd.f32 %v1571_v15, %v1511_v38 }
 0x1bd   : > { %2868 = vmatmul.mubr.msk.f32.gmra.mrb[28].mxu1 %vm1193_vm3, %v2216_v19  ;;  %v1763_v32 = vmul.f32 %v4614_v56, %v4668_v21  ;;  %v2084_v29 = vadd.f32 %v2068_v26, %v2008_v39  ;;  %v2106_v10 = vmul.f32 %v3648_v45, %v4157_v35  ;;  %v1801_v11 = vmul.f32 %v4185_v23, %v4159_v47  ;;  %v4194_v56 = vld [vmem:[%s4522_s7 + $0x2] ss:$0 sm:$0xff]  ;;  %v4670_v26 = vld [vmem:[#allocation17_spill] sm:$0xff] }
 0x1be   : > { %v1665_v13 = vadd.f32 %v1649_v46, %v1549_v7  ;;  %v2046_v12 = vadd.f32 %v2030_v27, %v1970_v34  ;;  %v1703_v5 = vadd.f32 %v1687_v22, %v1587_v44  ;;  %v1839_v33 = vmul.f32 %v3573_v55, %v4168_v28  ;;  %v4203_v27 = vld [vmem:[%s4522_s7 + $0x5] ss:$0 sm:$0xff]  ;;  %v4207_v19 = vld [vmem:[#allocation2 + $0xef] sm:$0xff] }
 0x1bf   : > { %v1917_v24 = vmul.f32 %v4194_v56, %v4669_v59  ;;  %v2154_v15 = vmul.f32 0.70710677, %v2084_v29  ;;  %v1955_v4 = vmul.f32 %v3585_v62, %v4670_v26  ;;  %v4671_v46 = vld [vmem:[#allocation20_spill] sm:$0xff]  ;;  %v4209_v22 = vld [vmem:[#allocation2 + $0xe9] sm:$0xff]  ;;  %v1382_v7 = vmul.f32 %v4095_v37, %v4663_v50 }
 0x1c0   : > { %v1741_v43 = vadd.f32 %v1725_v61, %v1665_v13  ;;  %v1993_v55 = vmul.f32 %v4203_v27, %v4671_v46  ;;  %v1779_v38 = vadd.f32 %v1763_v32, %v1703_v5  ;;  %4672 = vst [vmem:[#allocation12_spill] sm:$0xff] %v4209_v22  ;;  %v4211_v39 = vld [vmem:[#allocation3 + $0xef] sm:$0xff]  ;;  %v1420_v62 = vmul.f32 %v4104_v36, %v4664_v20 }
 0x1c1   : > { %v2973_v34 = vpop.eup %2972  ;;  %v1458_v61 = vmul.f32 %v4111_v0, %v4035_v49  ;;  %2974 = verf.f32 %v2154_v15  ;;  %v1496_v59 = vmul.f32 %v4124_v6, %v4043_v8  ;;  %v1398_v5 = vadd.f32 %v4118_v9, %v1382_v7 }
 0x1c2   : > { %v2185_v44 = vadd.f32 1.0, %v2973_v34  ;;  %v1817_v13 = vadd.f32 %v1801_v11, %v1741_v43  ;;  %v1855_v32 = vadd.f32 %v1839_v33, %v1779_v38  ;;  %v1436_v26 = vadd.f32 %v4131_v14, %v1420_v62 }
 0x1c3   : > { %v1534_v50 = vmul.f32 %v4137_v52, %v4207_v19  ;;  %v2069_v20 = vmul.f32 %v3634_v51, %v4209_v22  ;;  %v1572_v15 = vmul.f32 %v4144_v17, %v4211_v39  ;;  %v1474_v11 = vadd.f32 %v1458_v61, %v1398_v5  ;;  %v4242_v61 = vld [vmem:[#allocation3 + $0xe9] sm:$0xff] }
 0x1c4   : > { %v2201_v46 = vmul.f32 %v2185_v44, %v2137_v58  ;;  %v1933_v35 = vadd.f32 %v1917_v24, %v1817_v13  ;;  %v1512_v43 = vadd.f32 %v1496_v59, %v1436_v26  ;;  %v1650_v33 = vmul.f32 %v4153_v31, %v3963_v63  ;;  %v4236_v58 = vld [vmem:[%s4524_s9 + $0x5] ss:$0 sm:$0xff]  ;;  %v4240_v24 = vld [vmem:[#allocation2 + $0xf0] sm:$0xff] }
 0x1c5   : > { %v1688_v34 = vmul.f32 %v4164_v1, %v3965_v18  ;;  %v1971_v7 = vadd.f32 %v1955_v4, %v1855_v32  ;;  %v2031_v51 = vmul.f32 %v4236_v58, %v4063_v57  ;;  %v1550_v44 = vadd.f32 %v1534_v50, %v1474_v11  ;;  %v4244_v13 = vld [vmem:[#allocation3 + $0xf0] sm:$0xff]  ;;  %v4263_v11 = vld [vmem:[%s4524_s9 + $0x7] ss:$0 sm:$0xff] }
 0x1c6   : > { %v2217_v38 = vmul.f32 %v2201_v46, %v2121_v3  ;;  %v2009_v62 = vadd.f32 %v1993_v55, %v1933_v35  ;;  %v1588_v63 = vadd.f32 %v1572_v15, %v1512_v43  ;;  %4673 = vst [vmem:[#allocation16_spill] sm:$0xff] %v4244_v13  ;;  %v1726_v18 = vmul.f32 %v4173_v48, %v4065_v53  ;;  %v4251_v35 = vld [vmem:[%s4524_s9 + $0x4] ss:$0 sm:$0xff] }
 0x1c7   : > { %v1764_v3 = vmul.f32 %v4251_v35, %v4067_v60  ;;  %v2122_v4 = vadd.f32 %v2106_v10, %v2046_v12  ;;  %v2138_v55 = vmul.f32 0.5, %v2084_v29  ;;  %v1666_v59 = vadd.f32 %v1650_v33, %v1550_v44  ;;  %v4271_v33 = vld [vmem:[#allocation2 + $0x107] sm:$0xff] }
 0x1c8   : > { %2870 = vmatprep.mubr.msk.f32.mxu1 %vm1193_vm3, %v2217_v38  ;;  %v2085_v46 = vadd.f32 %v2069_v20, %v2009_v62  ;;  %v1704_v32 = vadd.f32 %v1688_v34, %v1588_v63  ;;  %v1802_v5 = vmul.f32 %v4185_v23, %v4240_v24  ;;  %v2047_v26 = vadd.f32 %v2031_v51, %v1971_v7  ;;  %v4267_v20 = vld [vmem:[#allocation2 + $0xf1] sm:$0xff]  ;;  %v4273_v34 = vld [vmem:[#allocation3 + $0x107] sm:$0xff] }
 0x1c9   : > { %v2107_v50 = vmul.f32 %v3648_v45, %v4242_v61  ;;  %v1840_v10 = vmul.f32 %v4263_v11, %v4244_v13  ;;  %v1742_v12 = vadd.f32 %v1726_v18, %v1666_v59  ;;  %4674 = vst [vmem:[#allocation7_spill] sm:$0xff] %v4267_v20  ;;  %v1918_v43 = vmul.f32 %v4194_v56, %v3975_v41 }
 0x1ca   : > { %v2155_v15 = vmul.f32 0.70710677, %v2085_v46  ;;  %v1780_v29 = vadd.f32 %v1764_v3, %v1704_v32  ;;  %4675 = vst [vmem:[#allocation9_spill] sm:$0xff] %v4271_v33  ;;  %4676 = vst [vmem:[#allocation15_spill] sm:$0xff] %v4273_v34  ;;  %v1383_v45 = vmul.f32 %v4095_v37, %v3990_v40  ;;  %v1421_v7 = vmul.f32 %v4104_v36, %v3994_v30  ;;  %v4289_v40 = vld [vmem:[%s4522_s7 + $0x8] ss:$0 sm:$0xff] }
 0x1cb   : > { %v2975_v38 = vpop.eup %2974  ;;  %v1459_v62 = vmul.f32 %v4111_v0, %v4088_v2  ;;  %v1497_v51 = vmul.f32 %v4124_v6, %v4090_v25  ;;  %v1818_v41 = vadd.f32 %v1802_v5, %v1742_v12  ;;  %v1994_v63 = vmul.f32 %v4203_v27, %v4099_v54  ;;  %v4303_v25 = vld [vmem:[%s4524_s9 + $0x2] ss:$0 sm:$0xff] }
 0x1cc   : > { %2976 = verf.f32 %v2155_v15  ;;  %v2186_v44 = vadd.f32 1.0, %v2975_v38  ;;  %v1399_v18 = vadd.f32 %v4118_v9, %v1383_v45  ;;  %v2070_v30 = vmul.f32 %v4289_v40, %v4267_v20 }
 0x1cd   : > { %v1437_v3 = vadd.f32 %v4131_v14, %v1421_v7  ;;  %v1535_v59 = vmul.f32 %v4137_v52, %v4271_v33  ;;  %v1573_v32 = vmul.f32 %v4144_v17, %v4273_v34  ;;  %v1934_v15 = vadd.f32 %v1918_v43, %v1818_v41  ;;  %v4307_v33 = vld [vmem:[#allocation2 + $0x108] sm:$0xff] }
 0x1ce   : > { %v2202_v5 = vmul.f32 %v2186_v44, %v2138_v55  ;;  %v1475_v12 = vadd.f32 %v1459_v62, %v1399_v18  ;;  %v1651_v45 = vmul.f32 %v4153_v31, %v4667_v16  ;;  %v1856_v38 = vadd.f32 %v1840_v10, %v1780_v29  ;;  %v4311_v62 = vld [vmem:[#allocation3 + $0xf1] sm:$0xff]  ;;  %v4313_v10 = vld [vmem:[#allocation3 + $0x108] sm:$0xff] }
 0x1cf   : > { %v1956_v7 = vmul.f32 %v4303_v25, %v4003_v42  ;;  %v1513_v20 = vadd.f32 %v1497_v51, %v1437_v3  ;;  %v1689_v55 = vmul.f32 %v4164_v1, %v4668_v21  ;;  %4677 = vst [vmem:[#allocation8_spill] sm:$0xff] %v4311_v62  ;;  %v2010_v44 = vadd.f32 %v1994_v63, %v1934_v15  ;;  %v4679_v51 = vld [vmem:[#allocation5_spill] sm:$0xff] }
 0x1d0   : > { %v2218_v43 = vmul.f32 %v2202_v5, %v2122_v4  ;;  %v1551_v16 = vadd.f32 %v1535_v59, %v1475_v12  ;;  %4678 = vst [vmem:[#allocation6_spill] sm:$0xff] %v4313_v10  ;;  %v1727_v29 = vmul.f32 %v4173_v48, %v4159_v47  ;;  %v2123_v41 = vadd.f32 %v2107_v50, %v2047_v26  ;;  %v4327_v26 = vld [vmem:[%s4524_s9 + $0x8] ss:$0 sm:$0xff] }
 0x1d1   : > { %v2139_v18 = vmul.f32 0.5, %v2085_v46  ;;  %v1589_v34 = vadd.f32 %v1573_v32, %v1513_v20  ;;  %v1765_v42 = vmul.f32 %v4251_v35, %v4168_v28  ;;  %v2032_v21 = vmul.f32 %v4236_v58, %v4679_v51 }
 0x1d2   : > { %2871 = vmatmul.mubr.msk.f32.gmra.mrb[30].mxu1 %vm1193_vm3, %v2218_v43  ;;  %v2086_v4 = vadd.f32 %v2070_v30, %v2010_v44  ;;  %v1667_v3 = vadd.f32 %v1651_v45, %v1551_v16  ;;  %v1803_v63 = vmul.f32 %v4185_v23, %v4307_v33  ;;  %v1972_v59 = vadd.f32 %v1956_v7, %v1856_v38  ;;  %v4680_v30 = vld [vmem:[#allocation20_spill] sm:$0xff]  ;;  %v4337_v45 = vld [vmem:[#allocation2 + $0x10f] sm:$0xff] }
 0x1d3   : > { %v2108_v46 = vmul.f32 %v4327_v26, %v4311_v62  ;;  %v1705_v50 = vadd.f32 %v1689_v55, %v1589_v34  ;;  %v1841_v20 = vmul.f32 %v4263_v11, %v4313_v10  ;;  %v1919_v15 = vmul.f32 %v4194_v56, %v4680_v30  ;;  %4681 = vst [vmem:[#allocation14_spill] sm:$0xff] %v4337_v45  ;;  %v4339_v43 = vld [vmem:[#allocation2 + $0x109] sm:$0xff] }
 0x1d4   : > { %v2156_v32 = vmul.f32 0.70710677, %v2086_v4  ;;  %v1743_v5 = vadd.f32 %v1727_v29, %v1667_v3  ;;  %v1995_v12 = vmul.f32 %v4203_v27, %v4209_v22  ;;  %v4341_v44 = vld [vmem:[#allocation3 + $0x10f] sm:$0xff]  ;;  %v1384_v34 = vmul.f32 %v4095_v37, %v4035_v49 }
 0x1d5   : > { %v1781_v7 = vadd.f32 %v1765_v42, %v1705_v50  ;;  %v1422_v55 = vmul.f32 %v4104_v36, %v4043_v8  ;;  %v1460_v16 = vmul.f32 %v4111_v0, %v4207_v19  ;;  %v1498_v30 = vmul.f32 %v4124_v6, %v4211_v39 }
 0x1d6   : > { %v2977_v38 = vpop.eup %2976  ;;  %2978 = verf.f32 %v2156_v32  ;;  %v1819_v3 = vadd.f32 %v1803_v63, %v1743_v5  ;;  %v2048_v42 = vadd.f32 %v2032_v21, %v1972_v59  ;;  %v1400_v50 = vadd.f32 %v4118_v9, %v1384_v34 }
 0x1d7   : > { %v2187_v29 = vadd.f32 1.0, %v2977_v38  ;;  %v1438_v62 = vadd.f32 %v4131_v14, %v1422_v55  ;;  %v1536_v49 = vmul.f32 %v4137_v52, %v4337_v45  ;;  %v2071_v8 = vmul.f32 %v4289_v40, %v4339_v43  ;;  %v4363_v45 = vld [vmem:[#allocation2 + $0x110] sm:$0xff] }
 0x1d8   : > { %v1935_v10 = vadd.f32 %v1919_v15, %v1819_v3  ;;  %v1574_v32 = vmul.f32 %v4144_v17, %v4341_v44  ;;  %v1476_v63 = vadd.f32 %v1460_v16, %v1400_v50  ;;  %v1652_v21 = vmul.f32 %v4153_v31, %v4065_v53 }
 0x1d9   : > { %v2203_v22 = vmul.f32 %v2187_v29, %v2139_v18  ;;  %v1514_v5 = vadd.f32 %v1498_v30, %v1438_v62  ;;  %v1857_v38 = vadd.f32 %v1841_v20, %v1781_v7  ;;  %v1957_v34 = vmul.f32 %v4303_v25, %v4063_v57  ;;  %v4365_v18 = vld [vmem:[#allocation3 + $0x109] sm:$0xff] }
 0x1da   : > { %v2011_v55 = vadd.f32 %v1995_v12, %v1935_v10  ;;  %4682 = vst [vmem:[#allocation13_spill] sm:$0xff] %v4365_v18  ;;  %v1552_v15 = vadd.f32 %v1536_v49, %v1476_v63  ;;  %v1690_v3 = vmul.f32 %v4164_v1, %v4067_v60  ;;  %v1728_v62 = vmul.f32 %v4173_v48, %v4240_v24 }
 0x1db   : > { %v2219_v59 = vmul.f32 %v2203_v22, %v2123_v41  ;;  %v1590_v29 = vadd.f32 %v1574_v32, %v1514_v5  ;;  %v2124_v53 = vadd.f32 %v2108_v46, %v2048_v42  ;;  %v2140_v41 = vmul.f32 0.5, %v2086_v4  ;;  %v4380_v46 = vld [vmem:[#allocation2 + $0x111] sm:$0xff]  ;;  %v1343_v42 = vld [vmem:[#allocation2 + $0x127] sm:$0xff] }
 0x1dc   : > { %v2087_v22 = vadd.f32 %v2071_v8, %v2011_v55  ;;  %v2033_v57 = vmul.f32 %v4236_v58, %v4242_v61  ;;  %v1668_v10 = vadd.f32 %v1652_v21, %v1552_v15  ;;  %v1804_v20 = vmul.f32 %v4185_v23, %v4363_v45  ;;  %4683 = vst [vmem:[#allocation10_spill] sm:$0xff] %v4380_v46  ;;  %v4684_v32 = vld [vmem:[#allocation4_spill] sm:$0xff]  ;;  %v4685_v5 = vld [vmem:[#allocation9_spill] sm:$0xff]  ;;  %v4392_v55 = vld [vmem:[#allocation3 + $0x110] sm:$0xff] }
 0x1dd   : > { %2873 = vmatprep.mubr.msk.f32.mxu1 %vm1193_vm3, %v2219_v59  ;;  %v1973_v12 = vadd.f32 %v1957_v34, %v1857_v38  ;;  %v2109_v7 = vmul.f32 %v4327_v26, %v4365_v18  ;;  %v1766_v16 = vmul.f32 %v4251_v35, %v4244_v13  ;;  %v1706_v30 = vadd.f32 %v1690_v3, %v1590_v29  ;;  %v4686_v59 = vld [vmem:[#allocation15_spill] sm:$0xff]  ;;  %v1363_v3 = vld [vmem:[#allocation3 + $0x127] sm:$0xff] }
 0x1de   : > { %v2157_v60 = vmul.f32 0.70710677, %v2087_v22  ;;  %v1744_v50 = vadd.f32 %v1728_v62, %v1668_v10  ;;  %v1920_v4 = vmul.f32 %v4194_v56, %v4099_v54  ;;  %v1385_v49 = vmul.f32 %v4095_v37, %v4088_v2  ;;  %v4687_v54 = vld [vmem:[#allocation7_spill] sm:$0xff] }
 0x1df   : > { %v1423_v63 = vmul.f32 %v4104_v36, %v4684_v32  ;;  %v1461_v21 = vmul.f32 %v4111_v0, %v4685_v5  ;;  %v1499_v38 = vmul.f32 %v4124_v6, %v4686_v59  ;;  %v1996_v29 = vmul.f32 %v4203_v27, %v4687_v54 }
 0x1e0   : > { %v2979_v8 = vpop.eup %2978  ;;  %2980 = verf.f32 %v2157_v60  ;;  %v1820_v15 = vadd.f32 %v1804_v20, %v1744_v50  ;;  %v1401_v2 = vadd.f32 %v4118_v9, %v1385_v49  ;;  %v2049_v62 = vadd.f32 %v2033_v57, %v1973_v12  ;;  %v1611_v12 = vld [vmem:[#allocation2 + $0x128] sm:$0xff] }
 0x1e1   : > { %v2188_v34 = vadd.f32 1.0, %v2979_v8  ;;  %v2072_v10 = vmul.f32 %v4289_v40, %v4380_v46  ;;  %v1439_v60 = vadd.f32 %v4131_v14, %v1423_v63  ;;  %v1537_v32 = vmul.f32 %v4137_v52, %v1343_v42 }
 0x1e2   : > { %v1936_v59 = vadd.f32 %v1920_v4, %v1820_v15  ;;  %v1477_v8 = vadd.f32 %v1461_v21, %v1401_v2  ;;  %v1653_v20 = vmul.f32 %v4153_v31, %v4159_v47  ;;  %v1782_v50 = vadd.f32 %v1766_v16, %v1706_v30  ;;  %v1344_v2 = vld [vmem:[#allocation2 + $0x12f] sm:$0xff] }
 0x1e3   : > { %v2204_v5 = vmul.f32 %v2188_v34, %v2140_v41  ;;  %v1842_v18 = vmul.f32 %v4263_v11, %v4392_v55  ;;  %v1515_v54 = vadd.f32 %v1499_v38, %v1439_v60  ;;  %v1575_v57 = vmul.f32 %v4144_v17, %v1363_v3  ;;  %v4689_v3 = vld [vmem:[#allocation12_spill] sm:$0xff] }
 0x1e4   : > { %v2012_v46 = vadd.f32 %v1996_v29, %v1936_v59  ;;  %v1553_v13 = vadd.f32 %v1537_v32, %v1477_v8  ;;  %v1729_v42 = vmul.f32 %v4173_v48, %v4307_v33  ;;  %v1958_v41 = vmul.f32 %v4303_v25, %v4679_v51  ;;  %v4688_v29 = vld [vmem:[#allocation6_spill] sm:$0xff]  ;;  %v1631_v8 = vld [vmem:[#allocation3 + $0x128] sm:$0xff] }
 0x1e5   : > { %v2220_v49 = vmul.f32 %v2204_v5, %v2124_v53  ;;  %v2125_v47 = vadd.f32 %v2109_v7, %v2049_v62  ;;  %v1805_v4 = vmul.f32 %v4185_v23, %v1611_v12  ;;  %v2141_v63 = vmul.f32 0.5, %v2087_v22  ;;  %v4690_v22 = vld [vmem:[#allocation14_spill] sm:$0xff] }
 0x1e6   : > { %v2088_v16 = vadd.f32 %v2072_v10, %v2012_v46  ;;  %v1669_v30 = vadd.f32 %v1653_v20, %v1553_v13  ;;  %v1858_v21 = vadd.f32 %v1842_v18, %v1782_v50  ;;  %v1591_v38 = vadd.f32 %v1575_v57, %v1515_v54  ;;  %v1879_v46 = vld [vmem:[#allocation2 + $0x129] sm:$0xff]  ;;  %v4691_v20 = vld [vmem:[#allocation8_spill] sm:$0xff]  ;;  %v1898_v12 = vld [vmem:[#allocation3 + $0x111] sm:$0xff] }
 0x1e7   : > { %2874 = vmatmul.mubr.msk.f32.gmra.mrb[32].mxu1 %vm1193_vm3, %v2220_v49  ;;  %v1691_v53 = vmul.f32 %v4164_v1, %v4168_v28  ;;  %v1767_v33 = vmul.f32 %v4251_v35, %v4688_v29  ;;  %v1921_v51 = vmul.f32 %v4194_v56, %v4689_v3  ;;  %v1997_v13 = vmul.f32 %v4203_v27, %v4339_v43  ;;  %v1364_v5 = vld [vmem:[#allocation3 + $0x12f] sm:$0xff] }
 0x1e8   : > { %v2158_v34 = vmul.f32 0.70710677, %v2088_v16  ;;  %v1745_v15 = vadd.f32 %v1729_v42, %v1669_v30  ;;  %v1386_v18 = vmul.f32 %v4095_v37, %v4207_v19  ;;  %v1424_v28 = vmul.f32 %v4104_v36, %v4211_v39 }
 0x1e9   : > { %v1462_v54 = vmul.f32 %v4111_v0, %v4690_v22  ;;  %v1500_v60 = vmul.f32 %v4124_v6, %v4341_v44  ;;  %v1707_v32 = vadd.f32 %v1691_v53, %v1591_v38  ;;  %v1538_v37 = vmul.f32 %v4137_v52, %v1344_v2  ;;  %v1612_v52 = vld [vmem:[#allocation2 + $0x130] sm:$0xff] }
 0x1ea   : > { %v2981_v7 = vpop.eup %2980  ;;  %2982 = verf.f32 %v2158_v34  ;;  %v1821_v10 = vadd.f32 %v1805_v4, %v1745_v15  ;;  %v1402_v59 = vadd.f32 %v4118_v9, %v1386_v18  ;;  %v1440_v43 = vadd.f32 %v4131_v14, %v1424_v28  ;;  %v4692_v34 = vld [vmem:[#allocation16_spill] sm:$0xff]  ;;  %v1880_v2 = vld [vmem:[#allocation2 + $0x131] sm:$0xff]  ;;  %v4695_v18 = vld [vmem:[#allocation13_spill] sm:$0xff] }
 0x1eb   : > { %v2189_v62 = vadd.f32 1.0, %v2981_v7  ;;  %v2073_v39 = vmul.f32 %v4289_v40, %v1879_v46  ;;  %v1974_v0 = vadd.f32 %v1958_v41, %v1858_v21  ;;  %v2034_v50 = vmul.f32 %v4236_v58, %v4691_v20 }
 0x1ec   : > { %v1937_v36 = vadd.f32 %v1921_v51, %v1821_v10  ;;  %v1478_v57 = vadd.f32 %v1462_v54, %v1402_v59  ;;  %v1654_v6 = vmul.f32 %v4153_v31, %v4240_v24  ;;  %v1516_v49 = vadd.f32 %v1500_v60, %v1440_v43  ;;  %v1899_v60 = vld [vmem:[#allocation3 + $0x129] sm:$0xff] }
 0x1ed   : > { %v2205_v19 = vmul.f32 %v2189_v62, %v2141_v63  ;;  %v1576_v14 = vmul.f32 %v4144_v17, %v1364_v5  ;;  %v1783_v42 = vadd.f32 %v1767_v33, %v1707_v32  ;;  %v1843_v30 = vmul.f32 %v4263_v11, %v1631_v8  ;;  %v1632_v62 = vld [vmem:[#allocation3 + $0x130] sm:$0xff] }
 0x1ee   : > { %v2013_v9 = vadd.f32 %v1997_v13, %v1937_v36  ;;  %v1554_v4 = vadd.f32 %v1538_v37, %v1478_v57  ;;  %v1730_v41 = vmul.f32 %v4173_v48, %v4363_v45  ;;  %v2050_v21 = vadd.f32 %v2034_v50, %v1974_v0  ;;  %v4693_v45 = vld [vmem:[#allocation7_spill] sm:$0xff]  ;;  %v4694_v13 = vld [vmem:[#allocation10_spill] sm:$0xff] }
 0x1ef   : > { %v2221_v44 = vmul.f32 %v2205_v19, %v2125_v47  ;;  %v2110_v31 = vmul.f32 %v4327_v26, %v1898_v12  ;;  %v1806_v47 = vmul.f32 %v4185_v23, %v1612_v52  ;;  %v1959_v17 = vmul.f32 %v4303_v25, %v4242_v61 }
 0x1f0   : > { %v2089_v63 = vadd.f32 %v2073_v39, %v2013_v9  ;;  %v1670_v24 = vadd.f32 %v1654_v6, %v1554_v4  ;;  %v1592_v53 = vadd.f32 %v1576_v14, %v1516_v49  ;;  %v1692_v15 = vmul.f32 %v4164_v1, %v4692_v34 }
 0x1f1   : > { %2876 = vmatprep.mubr.msk.f32.mxu1 %vm1193_vm3, %v2221_v44  ;;  %v2142_v29 = vmul.f32 0.5, %v2088_v16  ;;  %v1859_v33 = vadd.f32 %v1843_v30, %v1783_v42  ;;  %v1922_v3 = vmul.f32 %v4194_v56, %v4693_v45  ;;  %v2126_v7 = vadd.f32 %v2110_v31, %v2050_v21  ;;  %v1900_v44 = vld [vmem:[#allocation3 + $0x131] sm:$0xff] }
 0x1f2   : > { %v2159_v38 = vmul.f32 0.70710677, %v2089_v63  ;;  %v1746_v48 = vadd.f32 %v1730_v41, %v1670_v24  ;;  %v1998_v61 = vmul.f32 %v4203_v27, %v4694_v13  ;;  %v2035_v28 = vmul.f32 %v4236_v58, %v4695_v18 }
 0x1f3   : > { %v1708_v22 = vadd.f32 %v1692_v15, %v1592_v53  ;;  %v1768_v1 = vmul.f32 %v4251_v35, %v4392_v55  ;;  %v1975_v54 = vadd.f32 %v1959_v17, %v1859_v33  ;;  %v2074_v10 = vmul.f32 %v4289_v40, %v1880_v2 }
 0x1f4   : > { %v2983_v51 = vpop.eup %2982  ;;  %2984 = verf.f32 %v2159_v38  ;;  %v1822_v23 = vadd.f32 %v1806_v47, %v1746_v48  ;;  %v1844_v43 = vmul.f32 %v4263_v11, %v1632_v62  ;;  %v2111_v37 = vmul.f32 %v4327_v26, %v1899_v60 }
 0x1f5   : > { %v2190_v46 = vadd.f32 1.0, %v2983_v51  ;;  %v1784_v59 = vadd.f32 %v1768_v1, %v1708_v22  ;;  %v2051_v27 = vadd.f32 %v2035_v28, %v1975_v54  ;;  %v2143_v8 = vmul.f32 0.5, %v2089_v63 }
 0x1f6   : > { %v1938_v56 = vadd.f32 %v1922_v3, %v1822_v23  ;;  %v1960_v39 = vmul.f32 %v4303_v25, %v4691_v20  ;;  %v2036_v11 = vmul.f32 %v4236_v58, %v1898_v12  ;;  %v2112_v49 = vmul.f32 %v4327_v26, %v1900_v44  ;;  %v2651_v58 = vld [vmem:[%s4527_s12] ss:$0 sm:$0xff] }
 0x1f7   : > { %v2206_v16 = vmul.f32 %v2190_v46, %v2142_v29  ;;  %v1860_v36 = vadd.f32 %v1844_v43, %v1784_v59  ;;  %v2127_v40 = vadd.f32 %v2111_v37, %v2051_v27 }
 0x1f8   : > { %v2014_v5 = vadd.f32 %v1998_v61, %v1938_v56 }
 0x1f9   : > { %v2222_v32 = vmul.f32 %v2206_v16, %v2126_v7  ;;  %v1976_v57 = vadd.f32 %v1960_v39, %v1860_v36 }
 0x1fa   : > { %v2090_v19 = vadd.f32 %v2074_v10, %v2014_v5 }
 0x1fb   : > { %2877 = vmatmul.mubr.msk.f32.gmra.mrb[34].mxu1 %vm1193_vm3, %v2222_v32  ;;  %v2052_v9 = vadd.f32 %v2036_v11, %v1976_v57 }
 0x1fc   : > { %v2160_v35 = vmul.f32 0.70710677, %v2090_v19  ;;  %v2144_v14 = vmul.f32 0.5, %v2090_v19 }
 0x1fd   : > { %v2128_v42 = vadd.f32 %v2112_v49, %v2052_v9 }
 0x1fe   : > { %v2985_v55 = vpop.eup %2984  ;;  %2986 = verf.f32 %v2160_v35 }
 0x1ff   : > { %v2191_v0 = vadd.f32 1.0, %v2985_v55 }
 0x201   : > { %v2207_v50 = vmul.f32 %v2191_v0, %v2143_v8 }
 0x203   : > { %v2223_v6 = vmul.f32 %v2207_v50, %v2127_v40 }
 0x205   : > { %2879 = vmatprep.mubr.msk.f32.mxu1 %vm1193_vm3, %v2223_v6 }
 0x208   : > { %v2987_v52 = vpop.eup %2986 }
 0x209   : > { %v2192_v25 = vadd.f32 1.0, %v2987_v52 }
 0x20b   : > { %v2208_v20 = vmul.f32 %v2192_v25, %v2144_v14 }
 0x20d   : > { %v2224_v30 = vmul.f32 %v2208_v20, %v2128_v42 }
 0x20f   : > { %2880 = vmatmul.mubr.msk.f32.gmra.mrb[36].mxu1 %vm1193_vm3, %v2224_v30 }
 0x259   : > { %v2860_v12 = vpop.f32.mrb[22].mxu1 }
 0x25a   : > { %v2356_v4 = vadd.f32 %v2860_v12, %v2651_v58  ;;  %v2350_v41 = vpop.f32.mrb[23].mxu1 }
 0x25b   : > { %v2351_v26 = vadd.f32 %v2651_v58, %v2350_v41 }
 0x25c   : > { %2430 = vst.msk [vmem:[%s3186_s17 + $0x8] sm:$0xff] %vm532_vm1, %v2356_v4 }
 0x25d   : > { %2429 = vst.msk [vmem:[%s3186_s17] sm:$0xff] %vm532_vm1, %v2351_v26 }
 0x265   : > { %v2863_v63 = vpop.f32.mrb[24].mxu1 }
 0x266   : > { %v2366_v21 = vadd.f32 %v2863_v63, %v2651_v58  ;;  %v2360_v31 = vpop.f32.mrb[25].mxu1 }
 0x267   : > { %v2361_v24 = vadd.f32 %v2651_v58, %v2360_v31 }
 0x268   : > { %2432 = vst.msk [vmem:[%s3186_s17 + $0x18] sm:$0xff] %vm532_vm1, %v2366_v21 }
 0x269   : > { %2431 = vst.msk [vmem:[%s3186_s17 + $0x10] sm:$0xff] %vm532_vm1, %v2361_v24 }
 0x27a   : > { %v2866_v47 = vpop.f32.mrb[26].mxu1 }
 0x27b   : > { %v2376_v17 = vadd.f32 %v2866_v47, %v2651_v58  ;;  %v2370_v38 = vpop.f32.mrb[27].mxu1 }
 0x27c   : > { %v2371_v53 = vadd.f32 %v2651_v58, %v2370_v38 }
 0x27d   : > { %2434 = vst.msk [vmem:[%s3186_s17 + $0x28] sm:$0xff] %vm532_vm1, %v2376_v17 }
 0x27e   : > { %2433 = vst.msk [vmem:[%s3186_s17 + $0x20] sm:$0xff] %vm532_vm1, %v2371_v53 }
 0x290   : > { %v2869_v34 = vpop.f32.mrb[28].mxu1 }
 0x291   : > { %v2386_v15 = vadd.f32 %v2869_v34, %v2651_v58  ;;  %v2380_v29 = vpop.f32.mrb[29].mxu1 }
 0x292   : > { %v2381_v33 = vadd.f32 %v2651_v58, %v2380_v29 }
 0x293   : > { %2436 = vst.msk [vmem:[%s3186_s17 + $0x38] sm:$0xff] %vm532_vm1, %v2386_v15 }
 0x294   : > { %2435 = vst.msk [vmem:[%s3186_s17 + $0x30] sm:$0xff] %vm532_vm1, %v2381_v33 }
 0x2a5   : > { %v2872_v48 = vpop.f32.mrb[30].mxu1 }
 0x2a6   : > { %v2396_v45 = vadd.f32 %v2872_v48, %v2651_v58  ;;  %v2390_v3 = vpop.f32.mrb[31].mxu1 }
 0x2a7   : > { %v2391_v51 = vadd.f32 %v2651_v58, %v2390_v3 }
 0x2a8   : > { %2438 = vst.msk [vmem:[%s3186_s17 + $0x48] sm:$0xff] %vm532_vm1, %v2396_v45 }
 0x2a9   : > { %2437 = vst.msk [vmem:[%s3186_s17 + $0x40] sm:$0xff] %vm532_vm1, %v2391_v51 }
 0x2ba   : > { %v2875_v2 = vpop.f32.mrb[32].mxu1 }
 0x2bb   : > { %v2406_v7 = vadd.f32 %v2875_v2, %v2651_v58  ;;  %v2400_v46 = vpop.f32.mrb[33].mxu1 }
 0x2bc   : > { %v2401_v23 = vadd.f32 %v2651_v58, %v2400_v46 }
 0x2bd   : > { %2440 = vst.msk [vmem:[%s3186_s17 + $0x58] sm:$0xff] %vm532_vm1, %v2406_v7 }
 0x2be   : > { %2439 = vst.msk [vmem:[%s3186_s17 + $0x50] sm:$0xff] %vm532_vm1, %v2401_v23 }
 0x2ce   : > { %v2878_v13 = vpop.f32.mrb[34].mxu1 }
 0x2cf   : > { %v2416_v61 = vadd.f32 %v2878_v13, %v2651_v58  ;;  %v2410_v18 = vpop.f32.mrb[35].mxu1 }
 0x2d0   : > { %v2411_v28 = vadd.f32 %v2651_v58, %v2410_v18 }
 0x2d1   : > { %2442 = vst.msk [vmem:[%s3186_s17 + $0x68] sm:$0xff] %vm532_vm1, %v2416_v61 }
 0x2d2   : > { %2441 = vst.msk [vmem:[%s3186_s17 + $0x60] sm:$0xff] %vm532_vm1, %v2411_v28 }
 0x2e2   : > { %v2881_v22 = vpop.f32.mrb[36].mxu1 }
 0x2e3   : > { %v2426_v1 = vadd.f32 %v2881_v22, %v2651_v58  ;;  %v2420_v16 = vpop.f32.mrb[37].mxu1 }
 0x2e4   : > { %v2421_v54 = vadd.f32 %v2651_v58, %v2420_v16 }
 0x2e5   : > { %2444 = vst.msk [vmem:[%s3186_s17 + $0x78] sm:$0xff] %vm532_vm1, %v2426_v1 }
 0x2e6   : > { %2443 = vst.msk [vmem:[%s3186_s17 + $0x70] sm:$0xff] %vm532_vm1, %v2421_v54 }
 0x2e7 PF: > { %s23_s29 = sadd.s32 1, %s3046_s29   ;;  %s4696_s25 = smov %s3038_s27 }
 0x2e8   : > { %p20_p9 = scmp.ge.s32.totalorder %s23_s29, 6   ;;  %s4697_s26 = smov %s3042_s28 }
 0x2e9   : > { %s4698_s27 = smov %s4701_s30  ;;  %s4699_s28 = smov %s4705_s14 }
 0x2ea   :  { %22 = sbr.rel (!%p20_p9) target bundleno = 4 (0x4), region = 117 }

</bundles_post_ra>
